<compile_context>
chip_gen: v7x
topology: tpu7x:2x2x1
jax: 0.10.0
libtpu: 0.0.40
codegen_flags: <defaults>
</compile_context>

<pallas_src>
import functools
import math

import jax
import jax.numpy as jnp
from jax import lax
from jax.experimental import pallas as pl
from jax.experimental.pallas import tpu as pltpu


# ----------------------------------------------------------------------------
# Config (small synthetic BERT)
# ----------------------------------------------------------------------------
class Config:
    vocab_size = 30
    hidden_size = 32
    num_hidden_layers = 2
    num_attention_heads = 4
    intermediate_size = 64
    max_position_embeddings = 64
    type_vocab_size = 2
    num_classes = 3
    layer_norm_eps = 1e-12  # BertLayerNorm eps in pytorch_pretrained_bert


LANE = 128  # classifier output padded to one full lane row (lane-dense store)


# ----------------------------------------------------------------------------
# In-kernel helpers (pure jnp/lax, traced inside the Pallas kernel)
# ----------------------------------------------------------------------------
def _gelu_tanh(x):
    # tanh-form GELU: routes through the EUP tanh; ~1e-3 max abs err vs erf-GELU.
    c = math.sqrt(2.0 / math.pi)
    return 0.5 * x * (1.0 + jnp.tanh(c * (x + 0.044715 * x * x * x)))


def _layernorm(x, g, b, eps):
    mu = jnp.mean(x, axis=-1, keepdims=True)
    xc = x - mu
    var = jnp.mean(xc * xc, axis=-1, keepdims=True)
    return xc * lax.rsqrt(var + eps) * g + b


# ----------------------------------------------------------------------------
# Fused forward kernel (everything after the embedding gathers)
# ----------------------------------------------------------------------------
def _ernie_fused_kernel(
    emb_ref, mask2d_ref, emb_g_ref, emb_b_ref,
    wqkvT_ref, bqkvT_ref, wo_ref, bo_ref, ln1g_ref, ln1b_ref,
    wi_ref, bi_ref, wo2_ref, bo2_ref, ln2g_ref, ln2b_ref,
    poolw_ref, poolb_ref, fcw_ref, fcb_ref,
    out_ref,
    *, num_layers, B, S, H, nH, dh, eps,
):
    BS = B * S
    bf16 = jnp.bfloat16
    f32 = jnp.float32

    def mm(x_f32, w_bf16, b_f32):
        # bf16 MXU inputs, f32 accumulation, f32 bias add.
        y = jnp.dot(x_f32.astype(bf16), w_bf16, preferred_element_type=f32)
        return y + b_f32

    # Additive attention mask, broadcast over heads ONCE for all layers
    # (JAX does not CSE broadcast_in_dim, so hoist it).
    m3 = jnp.broadcast_to(mask2d_ref[...][None, :, :], (nH, BS, BS))

    # --- embedding LayerNorm ---
    h = _layernorm(emb_ref[...].astype(f32),
                   emb_g_ref[...], emb_b_ref[...], eps)          # [B*S, H]

    # --- encoder layers (statically unrolled; weights stacked on a leading L axis) ---
    # TODO(synk): for realistic ERNIE/BERT sizes, make the layer index a grid axis with
    # per-layer BlockSpec weight streaming (pipeline_mode=pl.Buffered(2)) instead of
    # whole-model VMEM residency (mandatory on v7x: 64 MiB VMEM), add a "parallel"
    # grid axis over batch/sequence tiles to use v7x's 2nd TensorCore, and pad H to a
    # multiple of 128 for lane-dense activations.
    for l in range(num_layers):
        # Fused QKV projection, produced directly feature-major (transposed):
        #   qkvT = Wqkv^T @ h^T  -> [3H, B*S]   (NT matmul, no activation transpose)
        # 1/sqrt(dh) is pre-folded into the Q rows of wqkvT/bqkvT (host side).
        qkvT = lax.dot_general(
            wqkvT_ref[l], h.astype(bf16),
            (((1,), (1,)), ((), ())),
            preferred_element_type=f32) + bqkvT_ref[l]           # [3H, B*S]

        # Head split = cheap sublane slices + reshapes (no per-head lane extracts).
        qT3 = qkvT[0:H].reshape(nH, dh, BS)                      # [nH, dh, B*S]
        kT3 = qkvT[H:2 * H].reshape(nH, dh, BS)
        vT3 = qkvT[2 * H:3 * H].reshape(nH, dh, BS)
        q3 = jnp.swapaxes(qT3, 1, 2)                             # [nH, B*S, dh]

        # Batched attention over all heads at once; cross-batch / padded keys are
        # killed by the additive mask (exp underflows to exactly 0).
        s = jnp.einsum('hqd,hdk->hqk', q3.astype(bf16), kT3.astype(bf16),
                       preferred_element_type=f32)               # [nH, B*S, B*S]
        s = s + m3
        s = s - jnp.max(s, axis=-1, keepdims=True)
        p = jnp.exp(s)
        p = p * pl.reciprocal(jnp.sum(p, axis=-1, keepdims=True), approx=True)
        ctxT = jnp.einsum('hdk,hqk->hdq', vT3.astype(bf16), p.astype(bf16),
                          preferred_element_type=f32)            # [nH, dh, B*S]
        ctx = jnp.transpose(ctxT.reshape(H, BS))                 # [B*S, H] in vregs

        # attention output projection + residual + LayerNorm (fused)
        attn_out = mm(ctx, wo_ref[l], bo_ref[l])
        h = _layernorm(attn_out + h, ln1g_ref[l], ln1b_ref[l], eps)

        # feed-forward (GELU) + residual + LayerNorm (fused)
        inter = _gelu_tanh(mm(h, wi_ref[l], bi_ref[l]))
        ffn_out = mm(inter, wo2_ref[l], bo2_ref[l])
        h = _layernorm(ffn_out + h, ln2g_ref[l], ln2b_ref[l], eps)

    # --- pooler (tanh dense on [CLS]) + classifier, batched over B ---
    cls = jnp.concatenate([h[b * S:b * S + 1, :] for b in range(B)], axis=0)  # [B, H]
    pooled = jnp.tanh(mm(cls, poolw_ref[...], poolb_ref[...]))                # [B, H]
    out_ref[...] = mm(pooled, fcw_ref[...], fcb_ref[...])       # single [B, LANE] store


# ----------------------------------------------------------------------------
# Parameter init (deterministic synthetic weights; stacked per-layer layout)
# ----------------------------------------------------------------------------
def init_params(key, cfg):
    H, I, L = cfg.hidden_size, cfg.intermediate_size, cfg.num_hidden_layers
    nH = cfg.num_attention_heads
    dh = H // nH
    counter = [0]

    def nxt():
        counter[0] += 1
        return jax.random.fold_in(key, counter[0])

    def w(shape, dtype=jnp.bfloat16):
        return (0.02 * jax.random.normal(nxt(), shape, jnp.float32)).astype(dtype)

    ones = lambda shape: jnp.ones(shape, jnp.float32)
    zeros = lambda shape: jnp.zeros(shape, jnp.float32)

    # QKV weight stored TRANSPOSED ([3H, H]) so the kernel projects straight into
    # feature-major layout; attention scale 1/sqrt(dh) folded into the Q rows.
    wqkvT = 0.02 * jax.random.normal(nxt(), (L, 3 * H, H), jnp.float32)
    wqkvT = wqkvT.at[:, :H, :].multiply(1.0 / math.sqrt(dh))
    bqkvT = zeros((L, 3 * H, 1))          # (zero bias; scale fold is a no-op on it)

    # classifier weight padded to a full 128-lane row (lane-dense output store)
    fc_w = jnp.zeros((H, LANE), jnp.float32)
    fc_w = fc_w.at[:, :cfg.num_classes].set(
        0.02 * jax.random.normal(nxt(), (H, cfg.num_classes), jnp.float32))

    return {
        # embedding tables stay f32 (gathered in plain JAX)
        "word_emb": w((cfg.vocab_size, H), jnp.float32),
        "pos_emb": w((cfg.max_position_embeddings, H), jnp.float32),
        "tok_emb": w((cfg.type_vocab_size, H), jnp.float32),
        "emb_ln_g": ones((1, H)), "emb_ln_b": zeros((1, H)),
        # per-layer weights stacked on a leading L axis; weights bf16 (MXU),
        # biases / LN params f32 (VPU)
        "wqkvT": wqkvT.astype(jnp.bfloat16), "bqkvT": bqkvT,
        "wo": w((L, H, H)), "bo": zeros((L, 1, H)),
        "ln1_g": ones((L, 1, H)), "ln1_b": zeros((L, 1, H)),
        "wi": w((L, H, I)), "bi": zeros((L, 1, I)),
        "wo2": w((L, I, H)), "bo2": zeros((L, 1, H)),
        "ln2_g": ones((L, 1, H)), "ln2_b": zeros((L, 1, H)),
        "pool_w": w((H, H)), "pool_b": zeros((1, H)),
        "fc_w": fc_w.astype(jnp.bfloat16), "fc_b": zeros((1, LANE)),
    }


# ----------------------------------------------------------------------------
# ERNIE forward:  x = (context, seq_len, mask) ;  out = fc(pooled)
# ----------------------------------------------------------------------------
def ernie_forward(params, x, cfg):
    context, _, mask = x               # context: [B,S] int32, mask: [B,S] {0,1}
    B, S = context.shape
    H = cfg.hidden_size
    nH = cfg.num_attention_heads
    dh = H // nH
    L = cfg.num_hidden_layers
    BS = B * S

    # --- glue: embedding gathers + sum ---
    word = params["word_emb"][context]                    # [B,S,H]
    pos = params["pos_emb"][:S][None, :, :]               # [1,S,H]
    tok = params["tok_emb"][0][None, None, :]             # token_type_ids = 0
    emb = (word + pos + tok).reshape(BS, H).astype(jnp.float32)

    # --- glue: additive attention mask over flattened B*S keys ---
    # 0 where (same batch AND key not padded), else -10000 (block-diagonal + padding).
    key_valid = (mask.reshape(BS) > 0)
    batch_ids = jnp.repeat(jnp.arange(B), S)
    allow = (batch_ids[:, None] == batch_ids[None, :]) & key_valid[None, :]
    mask2d = jnp.where(allow, 0.0, -10000.0).astype(jnp.float32)   # [BS, BS]

    kernel = functools.partial(
        _ernie_fused_kernel,
        num_layers=L, B=B, S=S, H=H, nH=nH, dh=dh, eps=cfg.layer_norm_eps)

    def full(a):
        nd = a.ndim
        return pl.BlockSpec(a.shape, lambda i, _nd=nd: (0,) * _nd)

    operands = [
        emb, mask2d,
        params["emb_ln_g"], params["emb_ln_b"],
        params["wqkvT"], params["bqkvT"],
        params["wo"], params["bo"],
        params["ln1_g"], params["ln1_b"],
        params["wi"], params["bi"],
        params["wo2"], params["bo2"],
        params["ln2_g"], params["ln2_b"],
        params["pool_w"], params["pool_b"],
        params["fc_w"], params["fc_b"],
    ]

    logits_pad = pl.pallas_call(
        kernel,
        out_shape=jax.ShapeDtypeStruct((B, LANE), jnp.float32),
        grid=(1,),
        in_specs=[full(a) for a in operands],
        out_specs=pl.BlockSpec((B, LANE), lambda i: (0, 0)),
        compiler_params=pltpu.CompilerParams(dimension_semantics=("arbitrary",)),
    )(*operands)

    return logits_pad[:, :cfg.num_classes]


# ----------------------------------------------------------------------------
if __name__ == "__main__":
    cfg = Config()
    B, S = 2, 8

    key = jax.random.PRNGKey(0)
    params = init_params(key, cfg)

    k1, _ = jax.random.split(jax.random.PRNGKey(0), 2)
    context = jax.random.randint(k1, (B, S), 0, cfg.vocab_size, dtype=jnp.int32)
    seq_len = jnp.array([S, S - 2], dtype=jnp.int32)           # (unused by forward)
    positions = jnp.arange(S, dtype=jnp.int32)[None, :]
    mask = (positions < seq_len[:, None]).astype(jnp.int32)    # padding mask

    out = ernie_forward(params, (context, seq_len, mask), cfg)
    out = jax.block_until_ready(out)
    assert out.shape == (B, cfg.num_classes)
    assert bool(jnp.all(jnp.isfinite(out)))
    print("KERNEL_OK")
</pallas_src>

<mosaic_0001>
module attributes {stable_mosaic.version = 11 : i64} {
  func.func @_ernie_fused_kernel(%arg0: i32, %arg1: memref<16x32xf32, #tpu.memory_space<vmem>>, %arg2: memref<16x16xf32, #tpu.memory_space<vmem>>, %arg3: memref<1x32xf32, #tpu.memory_space<vmem>>, %arg4: memref<1x32xf32, #tpu.memory_space<vmem>>, %arg5: memref<2x96x32xbf16, #tpu.memory_space<vmem>>, %arg6: memref<2x96x1xf32, #tpu.memory_space<vmem>>, %arg7: memref<2x32x32xbf16, #tpu.memory_space<vmem>>, %arg8: memref<2x1x32xf32, #tpu.memory_space<vmem>>, %arg9: memref<2x1x32xf32, #tpu.memory_space<vmem>>, %arg10: memref<2x1x32xf32, #tpu.memory_space<vmem>>, %arg11: memref<2x32x64xbf16, #tpu.memory_space<vmem>>, %arg12: memref<2x1x64xf32, #tpu.memory_space<vmem>>, %arg13: memref<2x64x32xbf16, #tpu.memory_space<vmem>>, %arg14: memref<2x1x32xf32, #tpu.memory_space<vmem>>, %arg15: memref<2x1x32xf32, #tpu.memory_space<vmem>>, %arg16: memref<2x1x32xf32, #tpu.memory_space<vmem>>, %arg17: memref<32x32xbf16, #tpu.memory_space<vmem>>, %arg18: memref<1x32xf32, #tpu.memory_space<vmem>>, %arg19: memref<32x128xbf16, #tpu.memory_space<vmem>>, %arg20: memref<1x128xf32, #tpu.memory_space<vmem>>, %arg21: memref<2x128xf32, #tpu.memory_space<vmem>>) attributes {dimension_semantics = [#tpu.dimension_semantics<arbitrary>], iteration_bounds = array<i64: 1>, scalar_prefetch = 0 : i64, scratch_operands = 0 : i64, tpu.core_type = #tpu.core_type<tc>, window_params = [{pipeline_mode = #tpu.pipeline_mode<synchronous>, transform_indices = @transform_0, window_bounds = array<i64: 16, 32>}, {pipeline_mode = #tpu.pipeline_mode<synchronous>, transform_indices = @transform_1, window_bounds = array<i64: 16, 16>}, {pipeline_mode = #tpu.pipeline_mode<synchronous>, transform_indices = @transform_2, window_bounds = array<i64: 1, 32>}, {pipeline_mode = #tpu.pipeline_mode<synchronous>, transform_indices = @transform_3, window_bounds = array<i64: 1, 32>}, {pipeline_mode = #tpu.pipeline_mode<synchronous>, transform_indices = @transform_4, window_bounds = array<i64: 2, 96, 32>}, {pipeline_mode = #tpu.pipeline_mode<synchronous>, transform_indices = @transform_5, window_bounds = array<i64: 2, 96, 1>}, {pipeline_mode = #tpu.pipeline_mode<synchronous>, transform_indices = @transform_6, window_bounds = array<i64: 2, 32, 32>}, {pipeline_mode = #tpu.pipeline_mode<synchronous>, transform_indices = @transform_7, window_bounds = array<i64: 2, 1, 32>}, {pipeline_mode = #tpu.pipeline_mode<synchronous>, transform_indices = @transform_8, window_bounds = array<i64: 2, 1, 32>}, {pipeline_mode = #tpu.pipeline_mode<synchronous>, transform_indices = @transform_9, window_bounds = array<i64: 2, 1, 32>}, {pipeline_mode = #tpu.pipeline_mode<synchronous>, transform_indices = @transform_10, window_bounds = array<i64: 2, 32, 64>}, {pipeline_mode = #tpu.pipeline_mode<synchronous>, transform_indices = @transform_11, window_bounds = array<i64: 2, 1, 64>}, {pipeline_mode = #tpu.pipeline_mode<synchronous>, transform_indices = @transform_12, window_bounds = array<i64: 2, 64, 32>}, {pipeline_mode = #tpu.pipeline_mode<synchronous>, transform_indices = @transform_13, window_bounds = array<i64: 2, 1, 32>}, {pipeline_mode = #tpu.pipeline_mode<synchronous>, transform_indices = @transform_14, window_bounds = array<i64: 2, 1, 32>}, {pipeline_mode = #tpu.pipeline_mode<synchronous>, transform_indices = @transform_15, window_bounds = array<i64: 2, 1, 32>}, {pipeline_mode = #tpu.pipeline_mode<synchronous>, transform_indices = @transform_16, window_bounds = array<i64: 32, 32>}, {pipeline_mode = #tpu.pipeline_mode<synchronous>, transform_indices = @transform_17, window_bounds = array<i64: 1, 32>}, {pipeline_mode = #tpu.pipeline_mode<synchronous>, transform_indices = @transform_18, window_bounds = array<i64: 32, 128>}, {pipeline_mode = #tpu.pipeline_mode<synchronous>, transform_indices = @transform_19, window_bounds = array<i64: 1, 128>}, {pipeline_mode = #tpu.pipeline_mode<synchronous>, transform_indices = @transform_20, window_bounds = array<i64: 2, 128>}]} {
    %c0 = arith.constant 0 : index
    %c0_0 = arith.constant 0 : index
    %0 = vector.load %arg2[%c0, %c0_0] : memref<16x16xf32, #tpu.memory_space<vmem>>, vector<16x16xf32>
    %1 = vector.shape_cast %0 : vector<16x16xf32> to vector<1x16x16xf32>
    %2 = vector.shape_cast %1 : vector<1x16x16xf32> to vector<1x16x16xf32>
    %3 = vector.broadcast %2 : vector<1x16x16xf32> to vector<4x16x16xf32>
    %c0_1 = arith.constant 0 : index
    %c0_2 = arith.constant 0 : index
    %4 = vector.load %arg1[%c0_1, %c0_2] : memref<16x32xf32, #tpu.memory_space<vmem>>, vector<16x32xf32>
    %c0_3 = arith.constant 0 : index
    %c0_4 = arith.constant 0 : index
    %5 = vector.load %arg3[%c0_3, %c0_4] : memref<1x32xf32, #tpu.memory_space<vmem>>, vector<1x32xf32>
    %c0_5 = arith.constant 0 : index
    %c0_6 = arith.constant 0 : index
    %6 = vector.load %arg4[%c0_5, %c0_6] : memref<1x32xf32, #tpu.memory_space<vmem>>, vector<1x32xf32>
    %cst = arith.constant dense<0.000000e+00> : vector<16xf32>
    %7 = vector.multi_reduction <add>, %4, %cst [1] : vector<16x32xf32> to vector<16xf32>
    %8 = vector.shape_cast %7 : vector<16xf32> to vector<16x1xf32>
    %cst_7 = arith.constant 3.200000e+01 : f32
    %9 = vector.broadcast %cst_7 : f32 to vector<16x1xf32>
    %10 = arith.divf %8, %9 : vector<16x1xf32>
    %11 = vector.broadcast %10 : vector<16x1xf32> to vector<16x32xf32>
    %12 = arith.subf %4, %11 : vector<16x32xf32>
    %13 = arith.mulf %12, %12 : vector<16x32xf32>
    %cst_8 = arith.constant dense<0.000000e+00> : vector<16xf32>
    %14 = vector.multi_reduction <add>, %13, %cst_8 [1] : vector<16x32xf32> to vector<16xf32>
    %15 = vector.shape_cast %14 : vector<16xf32> to vector<16x1xf32>
    %cst_9 = arith.constant 3.200000e+01 : f32
    %16 = vector.broadcast %cst_9 : f32 to vector<16x1xf32>
    %17 = arith.divf %15, %16 : vector<16x1xf32>
    %cst_10 = arith.constant 9.99999996E-13 : f32
    %18 = vector.broadcast %cst_10 : f32 to vector<16x1xf32>
    %19 = arith.addf %17, %18 : vector<16x1xf32>
    %20 = math.rsqrt %19 : vector<16x1xf32>
    %21 = vector.broadcast %20 : vector<16x1xf32> to vector<16x32xf32>
    %22 = arith.mulf %12, %21 : vector<16x32xf32>
    %23 = vector.broadcast %5 : vector<1x32xf32> to vector<16x32xf32>
    %24 = arith.mulf %22, %23 : vector<16x32xf32>
    %25 = vector.broadcast %6 : vector<1x32xf32> to vector<16x32xf32>
    %26 = arith.addf %24, %25 : vector<16x32xf32>
    %c0_11 = arith.constant 0 : index
    %c0_12 = arith.constant 0 : index
    %c0_13 = arith.constant 0 : index
    %27 = vector.load %arg5[%c0_11, %c0_12, %c0_13] : memref<2x96x32xbf16, #tpu.memory_space<vmem>>, vector<1x96x32xbf16>
    %28 = vector.shape_cast %27 : vector<1x96x32xbf16> to vector<96x32xbf16>
    %29 = arith.truncf %26 : vector<16x32xf32> to vector<16x32xbf16>
    %cst_14 = arith.constant dense<0.000000e+00> : vector<96x16xf32>
    %30 = tpu.matmul %28, %29, %cst_14 {dimension_numbers = #tpu.dot_dimension_numbers<[1], [1], [0], [0], [0, 0, 1, 0], [], []>} : vector<96x32xbf16>, vector<16x32xbf16>, vector<96x16xf32> -> vector<96x16xf32>
    %c0_15 = arith.constant 0 : index
    %c0_16 = arith.constant 0 : index
    %c0_17 = arith.constant 0 : index
    %31 = vector.load %arg6[%c0_15, %c0_16, %c0_17] : memref<2x96x1xf32, #tpu.memory_space<vmem>>, vector<1x96x1xf32>
    %32 = vector.shape_cast %31 : vector<1x96x1xf32> to vector<96x1xf32>
    %33 = vector.broadcast %32 : vector<96x1xf32> to vector<96x16xf32>
    %34 = arith.addf %30, %33 : vector<96x16xf32>
    %35 = vector.extract_strided_slice %34 {offsets = [0, 0], sizes = [32, 16], strides = [1, 1]} : vector<96x16xf32> to vector<32x16xf32>
    %36 = vector.shape_cast %35 : vector<32x16xf32> to vector<4x8x16xf32>
    %37 = vector.extract_strided_slice %34 {offsets = [32, 0], sizes = [32, 16], strides = [1, 1]} : vector<96x16xf32> to vector<32x16xf32>
    %38 = vector.shape_cast %37 : vector<32x16xf32> to vector<4x8x16xf32>
    %39 = vector.extract_strided_slice %34 {offsets = [64, 0], sizes = [32, 16], strides = [1, 1]} : vector<96x16xf32> to vector<32x16xf32>
    %40 = vector.shape_cast %39 : vector<32x16xf32> to vector<4x8x16xf32>
    %41 = tpu.transpose %36, [0, 2, 1] : vector<4x8x16xf32> -> vector<4x16x8xf32>
    %42 = arith.truncf %41 : vector<4x16x8xf32> to vector<4x16x8xbf16>
    %43 = arith.truncf %38 : vector<4x8x16xf32> to vector<4x8x16xbf16>
    "tpu.trace_start"() <{level = 10 : i32, message = "hqd,hdk->hqk"}> : () -> ()
    %cst_18 = arith.constant dense<0.000000e+00> : vector<4x16x16xf32>
    %44 = tpu.matmul %42, %43, %cst_18 {dimension_numbers = #tpu.dot_dimension_numbers<[2], [1], [1], [2], [0, 0, 0, 1, 1, 2], [0], [0]>} : vector<4x16x8xbf16>, vector<4x8x16xbf16>, vector<4x16x16xf32> -> vector<4x16x16xf32>
    "tpu.trace_stop"() : () -> ()
    %45 = arith.addf %44, %3 : vector<4x16x16xf32>
    %cst_19 = arith.constant dense<0xFF800000> : vector<4x16xf32>
    %46 = vector.multi_reduction <maximumf>, %45, %cst_19 [2] : vector<4x16x16xf32> to vector<4x16xf32>
    %47 = vector.shape_cast %46 : vector<4x16xf32> to vector<4x16x1xf32>
    %48 = vector.broadcast %47 : vector<4x16x1xf32> to vector<4x16x16xf32>
    %49 = arith.subf %45, %48 : vector<4x16x16xf32>
    %50 = math.exp %49 : vector<4x16x16xf32>
    %cst_20 = arith.constant dense<0.000000e+00> : vector<4x16xf32>
    %51 = vector.multi_reduction <add>, %50, %cst_20 [2] : vector<4x16x16xf32> to vector<4x16xf32>
    %52 = vector.shape_cast %51 : vector<4x16xf32> to vector<4x16x1xf32>
    %53 = tpu.reciprocal %52 {approx = true} : vector<4x16x1xf32> -> vector<4x16x1xf32>
    %54 = vector.broadcast %53 : vector<4x16x1xf32> to vector<4x16x16xf32>
    %55 = arith.mulf %50, %54 : vector<4x16x16xf32>
    %56 = arith.truncf %40 : vector<4x8x16xf32> to vector<4x8x16xbf16>
    %57 = arith.truncf %55 : vector<4x16x16xf32> to vector<4x16x16xbf16>
    "tpu.trace_start"() <{level = 10 : i32, message = "hdk,hqk->hdq"}> : () -> ()
    %cst_21 = arith.constant dense<0.000000e+00> : vector<4x8x16xf32>
    %58 = tpu.matmul %56, %57, %cst_21 {dimension_numbers = #tpu.dot_dimension_numbers<[2], [2], [1], [1], [0, 0, 0, 1, 1, 1], [0], [0]>} : vector<4x8x16xbf16>, vector<4x16x16xbf16>, vector<4x8x16xf32> -> vector<4x8x16xf32>
    "tpu.trace_stop"() : () -> ()
    %59 = vector.shape_cast %58 : vector<4x8x16xf32> to vector<32x16xf32>
    %60 = tpu.transpose %59, [1, 0] : vector<32x16xf32> -> vector<16x32xf32>
    %c0_22 = arith.constant 0 : index
    %c0_23 = arith.constant 0 : index
    %c0_24 = arith.constant 0 : index
    %61 = vector.load %arg7[%c0_22, %c0_23, %c0_24] : memref<2x32x32xbf16, #tpu.memory_space<vmem>>, vector<1x32x32xbf16>
    %62 = vector.shape_cast %61 : vector<1x32x32xbf16> to vector<32x32xbf16>
    %c0_25 = arith.constant 0 : index
    %c0_26 = arith.constant 0 : index
    %c0_27 = arith.constant 0 : index
    %63 = vector.load %arg8[%c0_25, %c0_26, %c0_27] : memref<2x1x32xf32, #tpu.memory_space<vmem>>, vector<1x1x32xf32>
    %64 = vector.shape_cast %63 : vector<1x1x32xf32> to vector<1x32xf32>
    %65 = arith.truncf %60 : vector<16x32xf32> to vector<16x32xbf16>
    %cst_28 = arith.constant dense<0.000000e+00> : vector<16x32xf32>
    %66 = tpu.matmul %65, %62, %cst_28 {dimension_numbers = #tpu.dot_dimension_numbers<[1], [0], [0], [1], [0, 0, 1, 1], [], []>} : vector<16x32xbf16>, vector<32x32xbf16>, vector<16x32xf32> -> vector<16x32xf32>
    %67 = vector.broadcast %64 : vector<1x32xf32> to vector<16x32xf32>
    %68 = arith.addf %66, %67 : vector<16x32xf32>
    %69 = arith.addf %68, %26 : vector<16x32xf32>
    %c0_29 = arith.constant 0 : index
    %c0_30 = arith.constant 0 : index
    %c0_31 = arith.constant 0 : index
    %70 = vector.load %arg9[%c0_29, %c0_30, %c0_31] : memref<2x1x32xf32, #tpu.memory_space<vmem>>, vector<1x1x32xf32>
    %71 = vector.shape_cast %70 : vector<1x1x32xf32> to vector<1x32xf32>
    %c0_32 = arith.constant 0 : index
    %c0_33 = arith.constant 0 : index
    %c0_34 = arith.constant 0 : index
    %72 = vector.load %arg10[%c0_32, %c0_33, %c0_34] : memref<2x1x32xf32, #tpu.memory_space<vmem>>, vector<1x1x32xf32>
    %73 = vector.shape_cast %72 : vector<1x1x32xf32> to vector<1x32xf32>
    %cst_35 = arith.constant dense<0.000000e+00> : vector<16xf32>
    %74 = vector.multi_reduction <add>, %69, %cst_35 [1] : vector<16x32xf32> to vector<16xf32>
    %75 = vector.shape_cast %74 : vector<16xf32> to vector<16x1xf32>
    %cst_36 = arith.constant 3.200000e+01 : f32
    %76 = vector.broadcast %cst_36 : f32 to vector<16x1xf32>
    %77 = arith.divf %75, %76 : vector<16x1xf32>
    %78 = vector.broadcast %77 : vector<16x1xf32> to vector<16x32xf32>
    %79 = arith.subf %69, %78 : vector<16x32xf32>
    %80 = arith.mulf %79, %79 : vector<16x32xf32>
    %cst_37 = arith.constant dense<0.000000e+00> : vector<16xf32>
    %81 = vector.multi_reduction <add>, %80, %cst_37 [1] : vector<16x32xf32> to vector<16xf32>
    %82 = vector.shape_cast %81 : vector<16xf32> to vector<16x1xf32>
    %cst_38 = arith.constant 3.200000e+01 : f32
    %83 = vector.broadcast %cst_38 : f32 to vector<16x1xf32>
    %84 = arith.divf %82, %83 : vector<16x1xf32>
    %cst_39 = arith.constant 9.99999996E-13 : f32
    %85 = vector.broadcast %cst_39 : f32 to vector<16x1xf32>
    %86 = arith.addf %84, %85 : vector<16x1xf32>
    %87 = math.rsqrt %86 : vector<16x1xf32>
    %88 = vector.broadcast %87 : vector<16x1xf32> to vector<16x32xf32>
    %89 = arith.mulf %79, %88 : vector<16x32xf32>
    %90 = vector.broadcast %71 : vector<1x32xf32> to vector<16x32xf32>
    %91 = arith.mulf %89, %90 : vector<16x32xf32>
    %92 = vector.broadcast %73 : vector<1x32xf32> to vector<16x32xf32>
    %93 = arith.addf %91, %92 : vector<16x32xf32>
    %c0_40 = arith.constant 0 : index
    %c0_41 = arith.constant 0 : index
    %c0_42 = arith.constant 0 : index
    %94 = vector.load %arg11[%c0_40, %c0_41, %c0_42] : memref<2x32x64xbf16, #tpu.memory_space<vmem>>, vector<1x32x64xbf16>
    %95 = vector.shape_cast %94 : vector<1x32x64xbf16> to vector<32x64xbf16>
    %c0_43 = arith.constant 0 : index
    %c0_44 = arith.constant 0 : index
    %c0_45 = arith.constant 0 : index
    %96 = vector.load %arg12[%c0_43, %c0_44, %c0_45] : memref<2x1x64xf32, #tpu.memory_space<vmem>>, vector<1x1x64xf32>
    %97 = vector.shape_cast %96 : vector<1x1x64xf32> to vector<1x64xf32>
    %98 = arith.truncf %93 : vector<16x32xf32> to vector<16x32xbf16>
    %cst_46 = arith.constant dense<0.000000e+00> : vector<16x64xf32>
    %99 = tpu.matmul %98, %95, %cst_46 {dimension_numbers = #tpu.dot_dimension_numbers<[1], [0], [0], [1], [0, 0, 1, 1], [], []>} : vector<16x32xbf16>, vector<32x64xbf16>, vector<16x64xf32> -> vector<16x64xf32>
    %100 = vector.broadcast %97 : vector<1x64xf32> to vector<16x64xf32>
    %101 = arith.addf %99, %100 : vector<16x64xf32>
    %cst_47 = arith.constant 5.000000e-01 : f32
    %102 = vector.broadcast %cst_47 : f32 to vector<16x64xf32>
    %103 = arith.mulf %102, %101 : vector<16x64xf32>
    %cst_48 = arith.constant 4.471500e-02 : f32
    %104 = vector.broadcast %cst_48 : f32 to vector<16x64xf32>
    %105 = arith.mulf %104, %101 : vector<16x64xf32>
    %106 = arith.mulf %105, %101 : vector<16x64xf32>
    %107 = arith.mulf %106, %101 : vector<16x64xf32>
    %108 = arith.addf %101, %107 : vector<16x64xf32>
    %cst_49 = arith.constant 0.797884583 : f32
    %109 = vector.broadcast %cst_49 : f32 to vector<16x64xf32>
    %110 = arith.mulf %109, %108 : vector<16x64xf32>
    %111 = math.tanh %110 : vector<16x64xf32>
    %cst_50 = arith.constant 1.000000e+00 : f32
    %112 = vector.broadcast %cst_50 : f32 to vector<16x64xf32>
    %113 = arith.addf %112, %111 : vector<16x64xf32>
    %114 = arith.mulf %103, %113 : vector<16x64xf32>
    %c0_51 = arith.constant 0 : index
    %c0_52 = arith.constant 0 : index
    %c0_53 = arith.constant 0 : index
    %115 = vector.load %arg13[%c0_51, %c0_52, %c0_53] : memref<2x64x32xbf16, #tpu.memory_space<vmem>>, vector<1x64x32xbf16>
    %116 = vector.shape_cast %115 : vector<1x64x32xbf16> to vector<64x32xbf16>
    %c0_54 = arith.constant 0 : index
    %c0_55 = arith.constant 0 : index
    %c0_56 = arith.constant 0 : index
    %117 = vector.load %arg14[%c0_54, %c0_55, %c0_56] : memref<2x1x32xf32, #tpu.memory_space<vmem>>, vector<1x1x32xf32>
    %118 = vector.shape_cast %117 : vector<1x1x32xf32> to vector<1x32xf32>
    %119 = arith.truncf %114 : vector<16x64xf32> to vector<16x64xbf16>
    %cst_57 = arith.constant dense<0.000000e+00> : vector<16x32xf32>
    %120 = tpu.matmul %119, %116, %cst_57 {dimension_numbers = #tpu.dot_dimension_numbers<[1], [0], [0], [1], [0, 0, 1, 1], [], []>} : vector<16x64xbf16>, vector<64x32xbf16>, vector<16x32xf32> -> vector<16x32xf32>
    %121 = vector.broadcast %118 : vector<1x32xf32> to vector<16x32xf32>
    %122 = arith.addf %120, %121 : vector<16x32xf32>
    %123 = arith.addf %122, %93 : vector<16x32xf32>
    %c0_58 = arith.constant 0 : index
    %c0_59 = arith.constant 0 : index
    %c0_60 = arith.constant 0 : index
    %124 = vector.load %arg15[%c0_58, %c0_59, %c0_60] : memref<2x1x32xf32, #tpu.memory_space<vmem>>, vector<1x1x32xf32>
    %125 = vector.shape_cast %124 : vector<1x1x32xf32> to vector<1x32xf32>
    %c0_61 = arith.constant 0 : index
    %c0_62 = arith.constant 0 : index
    %c0_63 = arith.constant 0 : index
    %126 = vector.load %arg16[%c0_61, %c0_62, %c0_63] : memref<2x1x32xf32, #tpu.memory_space<vmem>>, vector<1x1x32xf32>
    %127 = vector.shape_cast %126 : vector<1x1x32xf32> to vector<1x32xf32>
    %cst_64 = arith.constant dense<0.000000e+00> : vector<16xf32>
    %128 = vector.multi_reduction <add>, %123, %cst_64 [1] : vector<16x32xf32> to vector<16xf32>
    %129 = vector.shape_cast %128 : vector<16xf32> to vector<16x1xf32>
    %cst_65 = arith.constant 3.200000e+01 : f32
    %130 = vector.broadcast %cst_65 : f32 to vector<16x1xf32>
    %131 = arith.divf %129, %130 : vector<16x1xf32>
    %132 = vector.broadcast %131 : vector<16x1xf32> to vector<16x32xf32>
    %133 = arith.subf %123, %132 : vector<16x32xf32>
    %134 = arith.mulf %133, %133 : vector<16x32xf32>
    %cst_66 = arith.constant dense<0.000000e+00> : vector<16xf32>
    %135 = vector.multi_reduction <add>, %134, %cst_66 [1] : vector<16x32xf32> to vector<16xf32>
    %136 = vector.shape_cast %135 : vector<16xf32> to vector<16x1xf32>
    %cst_67 = arith.constant 3.200000e+01 : f32
    %137 = vector.broadcast %cst_67 : f32 to vector<16x1xf32>
    %138 = arith.divf %136, %137 : vector<16x1xf32>
    %cst_68 = arith.constant 9.99999996E-13 : f32
    %139 = vector.broadcast %cst_68 : f32 to vector<16x1xf32>
    %140 = arith.addf %138, %139 : vector<16x1xf32>
    %141 = math.rsqrt %140 : vector<16x1xf32>
    %142 = vector.broadcast %141 : vector<16x1xf32> to vector<16x32xf32>
    %143 = arith.mulf %133, %142 : vector<16x32xf32>
    %144 = vector.broadcast %125 : vector<1x32xf32> to vector<16x32xf32>
    %145 = arith.mulf %143, %144 : vector<16x32xf32>
    %146 = vector.broadcast %127 : vector<1x32xf32> to vector<16x32xf32>
    %147 = arith.addf %145, %146 : vector<16x32xf32>
    %c1 = arith.constant 1 : index
    %c0_69 = arith.constant 0 : index
    %c0_70 = arith.constant 0 : index
    %148 = vector.load %arg5[%c1, %c0_69, %c0_70] : memref<2x96x32xbf16, #tpu.memory_space<vmem>>, vector<1x96x32xbf16>
    %149 = vector.shape_cast %148 : vector<1x96x32xbf16> to vector<96x32xbf16>
    %150 = arith.truncf %147 : vector<16x32xf32> to vector<16x32xbf16>
    %cst_71 = arith.constant dense<0.000000e+00> : vector<96x16xf32>
    %151 = tpu.matmul %149, %150, %cst_71 {dimension_numbers = #tpu.dot_dimension_numbers<[1], [1], [0], [0], [0, 0, 1, 0], [], []>} : vector<96x32xbf16>, vector<16x32xbf16>, vector<96x16xf32> -> vector<96x16xf32>
    %c1_72 = arith.constant 1 : index
    %c0_73 = arith.constant 0 : index
    %c0_74 = arith.constant 0 : index
    %152 = vector.load %arg6[%c1_72, %c0_73, %c0_74] : memref<2x96x1xf32, #tpu.memory_space<vmem>>, vector<1x96x1xf32>
    %153 = vector.shape_cast %152 : vector<1x96x1xf32> to vector<96x1xf32>
    %154 = vector.broadcast %153 : vector<96x1xf32> to vector<96x16xf32>
    %155 = arith.addf %151, %154 : vector<96x16xf32>
    %156 = vector.extract_strided_slice %155 {offsets = [0, 0], sizes = [32, 16], strides = [1, 1]} : vector<96x16xf32> to vector<32x16xf32>
    %157 = vector.shape_cast %156 : vector<32x16xf32> to vector<4x8x16xf32>
    %158 = vector.extract_strided_slice %155 {offsets = [32, 0], sizes = [32, 16], strides = [1, 1]} : vector<96x16xf32> to vector<32x16xf32>
    %159 = vector.shape_cast %158 : vector<32x16xf32> to vector<4x8x16xf32>
    %160 = vector.extract_strided_slice %155 {offsets = [64, 0], sizes = [32, 16], strides = [1, 1]} : vector<96x16xf32> to vector<32x16xf32>
    %161 = vector.shape_cast %160 : vector<32x16xf32> to vector<4x8x16xf32>
    %162 = tpu.transpose %157, [0, 2, 1] : vector<4x8x16xf32> -> vector<4x16x8xf32>
    %163 = arith.truncf %162 : vector<4x16x8xf32> to vector<4x16x8xbf16>
    %164 = arith.truncf %159 : vector<4x8x16xf32> to vector<4x8x16xbf16>
    "tpu.trace_start"() <{level = 10 : i32, message = "hqd,hdk->hqk"}> : () -> ()
    %cst_75 = arith.constant dense<0.000000e+00> : vector<4x16x16xf32>
    %165 = tpu.matmul %163, %164, %cst_75 {dimension_numbers = #tpu.dot_dimension_numbers<[2], [1], [1], [2], [0, 0, 0, 1, 1, 2], [0], [0]>} : vector<4x16x8xbf16>, vector<4x8x16xbf16>, vector<4x16x16xf32> -> vector<4x16x16xf32>
    "tpu.trace_stop"() : () -> ()
    %166 = arith.addf %165, %3 : vector<4x16x16xf32>
    %cst_76 = arith.constant dense<0xFF800000> : vector<4x16xf32>
    %167 = vector.multi_reduction <maximumf>, %166, %cst_76 [2] : vector<4x16x16xf32> to vector<4x16xf32>
    %168 = vector.shape_cast %167 : vector<4x16xf32> to vector<4x16x1xf32>
    %169 = vector.broadcast %168 : vector<4x16x1xf32> to vector<4x16x16xf32>
    %170 = arith.subf %166, %169 : vector<4x16x16xf32>
    %171 = math.exp %170 : vector<4x16x16xf32>
    %cst_77 = arith.constant dense<0.000000e+00> : vector<4x16xf32>
    %172 = vector.multi_reduction <add>, %171, %cst_77 [2] : vector<4x16x16xf32> to vector<4x16xf32>
    %173 = vector.shape_cast %172 : vector<4x16xf32> to vector<4x16x1xf32>
    %174 = tpu.reciprocal %173 {approx = true} : vector<4x16x1xf32> -> vector<4x16x1xf32>
    %175 = vector.broadcast %174 : vector<4x16x1xf32> to vector<4x16x16xf32>
    %176 = arith.mulf %171, %175 : vector<4x16x16xf32>
    %177 = arith.truncf %161 : vector<4x8x16xf32> to vector<4x8x16xbf16>
    %178 = arith.truncf %176 : vector<4x16x16xf32> to vector<4x16x16xbf16>
    "tpu.trace_start"() <{level = 10 : i32, message = "hdk,hqk->hdq"}> : () -> ()
    %cst_78 = arith.constant dense<0.000000e+00> : vector<4x8x16xf32>
    %179 = tpu.matmul %177, %178, %cst_78 {dimension_numbers = #tpu.dot_dimension_numbers<[2], [2], [1], [1], [0, 0, 0, 1, 1, 1], [0], [0]>} : vector<4x8x16xbf16>, vector<4x16x16xbf16>, vector<4x8x16xf32> -> vector<4x8x16xf32>
    "tpu.trace_stop"() : () -> ()
    %180 = vector.shape_cast %179 : vector<4x8x16xf32> to vector<32x16xf32>
    %181 = tpu.transpose %180, [1, 0] : vector<32x16xf32> -> vector<16x32xf32>
    %c1_79 = arith.constant 1 : index
    %c0_80 = arith.constant 0 : index
    %c0_81 = arith.constant 0 : index
    %182 = vector.load %arg7[%c1_79, %c0_80, %c0_81] : memref<2x32x32xbf16, #tpu.memory_space<vmem>>, vector<1x32x32xbf16>
    %183 = vector.shape_cast %182 : vector<1x32x32xbf16> to vector<32x32xbf16>
    %c1_82 = arith.constant 1 : index
    %c0_83 = arith.constant 0 : index
    %c0_84 = arith.constant 0 : index
    %184 = vector.load %arg8[%c1_82, %c0_83, %c0_84] : memref<2x1x32xf32, #tpu.memory_space<vmem>>, vector<1x1x32xf32>
    %185 = vector.shape_cast %184 : vector<1x1x32xf32> to vector<1x32xf32>
    %186 = arith.truncf %181 : vector<16x32xf32> to vector<16x32xbf16>
    %cst_85 = arith.constant dense<0.000000e+00> : vector<16x32xf32>
    %187 = tpu.matmul %186, %183, %cst_85 {dimension_numbers = #tpu.dot_dimension_numbers<[1], [0], [0], [1], [0, 0, 1, 1], [], []>} : vector<16x32xbf16>, vector<32x32xbf16>, vector<16x32xf32> -> vector<16x32xf32>
    %188 = vector.broadcast %185 : vector<1x32xf32> to vector<16x32xf32>
    %189 = arith.addf %187, %188 : vector<16x32xf32>
    %190 = arith.addf %189, %147 : vector<16x32xf32>
    %c1_86 = arith.constant 1 : index
    %c0_87 = arith.constant 0 : index
    %c0_88 = arith.constant 0 : index
    %191 = vector.load %arg9[%c1_86, %c0_87, %c0_88] : memref<2x1x32xf32, #tpu.memory_space<vmem>>, vector<1x1x32xf32>
    %192 = vector.shape_cast %191 : vector<1x1x32xf32> to vector<1x32xf32>
    %c1_89 = arith.constant 1 : index
    %c0_90 = arith.constant 0 : index
    %c0_91 = arith.constant 0 : index
    %193 = vector.load %arg10[%c1_89, %c0_90, %c0_91] : memref<2x1x32xf32, #tpu.memory_space<vmem>>, vector<1x1x32xf32>
    %194 = vector.shape_cast %193 : vector<1x1x32xf32> to vector<1x32xf32>
    %cst_92 = arith.constant dense<0.000000e+00> : vector<16xf32>
    %195 = vector.multi_reduction <add>, %190, %cst_92 [1] : vector<16x32xf32> to vector<16xf32>
    %196 = vector.shape_cast %195 : vector<16xf32> to vector<16x1xf32>
    %cst_93 = arith.constant 3.200000e+01 : f32
    %197 = vector.broadcast %cst_93 : f32 to vector<16x1xf32>
    %198 = arith.divf %196, %197 : vector<16x1xf32>
    %199 = vector.broadcast %198 : vector<16x1xf32> to vector<16x32xf32>
    %200 = arith.subf %190, %199 : vector<16x32xf32>
    %201 = arith.mulf %200, %200 : vector<16x32xf32>
    %cst_94 = arith.constant dense<0.000000e+00> : vector<16xf32>
    %202 = vector.multi_reduction <add>, %201, %cst_94 [1] : vector<16x32xf32> to vector<16xf32>
    %203 = vector.shape_cast %202 : vector<16xf32> to vector<16x1xf32>
    %cst_95 = arith.constant 3.200000e+01 : f32
    %204 = vector.broadcast %cst_95 : f32 to vector<16x1xf32>
    %205 = arith.divf %203, %204 : vector<16x1xf32>
    %cst_96 = arith.constant 9.99999996E-13 : f32
    %206 = vector.broadcast %cst_96 : f32 to vector<16x1xf32>
    %207 = arith.addf %205, %206 : vector<16x1xf32>
    %208 = math.rsqrt %207 : vector<16x1xf32>
    %209 = vector.broadcast %208 : vector<16x1xf32> to vector<16x32xf32>
    %210 = arith.mulf %200, %209 : vector<16x32xf32>
    %211 = vector.broadcast %192 : vector<1x32xf32> to vector<16x32xf32>
    %212 = arith.mulf %210, %211 : vector<16x32xf32>
    %213 = vector.broadcast %194 : vector<1x32xf32> to vector<16x32xf32>
    %214 = arith.addf %212, %213 : vector<16x32xf32>
    %c1_97 = arith.constant 1 : index
    %c0_98 = arith.constant 0 : index
    %c0_99 = arith.constant 0 : index
    %215 = vector.load %arg11[%c1_97, %c0_98, %c0_99] : memref<2x32x64xbf16, #tpu.memory_space<vmem>>, vector<1x32x64xbf16>
    %216 = vector.shape_cast %215 : vector<1x32x64xbf16> to vector<32x64xbf16>
    %c1_100 = arith.constant 1 : index
    %c0_101 = arith.constant 0 : index
    %c0_102 = arith.constant 0 : index
    %217 = vector.load %arg12[%c1_100, %c0_101, %c0_102] : memref<2x1x64xf32, #tpu.memory_space<vmem>>, vector<1x1x64xf32>
    %218 = vector.shape_cast %217 : vector<1x1x64xf32> to vector<1x64xf32>
    %219 = arith.truncf %214 : vector<16x32xf32> to vector<16x32xbf16>
    %cst_103 = arith.constant dense<0.000000e+00> : vector<16x64xf32>
    %220 = tpu.matmul %219, %216, %cst_103 {dimension_numbers = #tpu.dot_dimension_numbers<[1], [0], [0], [1], [0, 0, 1, 1], [], []>} : vector<16x32xbf16>, vector<32x64xbf16>, vector<16x64xf32> -> vector<16x64xf32>
    %221 = vector.broadcast %218 : vector<1x64xf32> to vector<16x64xf32>
    %222 = arith.addf %220, %221 : vector<16x64xf32>
    %cst_104 = arith.constant 5.000000e-01 : f32
    %223 = vector.broadcast %cst_104 : f32 to vector<16x64xf32>
    %224 = arith.mulf %223, %222 : vector<16x64xf32>
    %cst_105 = arith.constant 4.471500e-02 : f32
    %225 = vector.broadcast %cst_105 : f32 to vector<16x64xf32>
    %226 = arith.mulf %225, %222 : vector<16x64xf32>
    %227 = arith.mulf %226, %222 : vector<16x64xf32>
    %228 = arith.mulf %227, %222 : vector<16x64xf32>
    %229 = arith.addf %222, %228 : vector<16x64xf32>
    %cst_106 = arith.constant 0.797884583 : f32
    %230 = vector.broadcast %cst_106 : f32 to vector<16x64xf32>
    %231 = arith.mulf %230, %229 : vector<16x64xf32>
    %232 = math.tanh %231 : vector<16x64xf32>
    %cst_107 = arith.constant 1.000000e+00 : f32
    %233 = vector.broadcast %cst_107 : f32 to vector<16x64xf32>
    %234 = arith.addf %233, %232 : vector<16x64xf32>
    %235 = arith.mulf %224, %234 : vector<16x64xf32>
    %c1_108 = arith.constant 1 : index
    %c0_109 = arith.constant 0 : index
    %c0_110 = arith.constant 0 : index
    %236 = vector.load %arg13[%c1_108, %c0_109, %c0_110] : memref<2x64x32xbf16, #tpu.memory_space<vmem>>, vector<1x64x32xbf16>
    %237 = vector.shape_cast %236 : vector<1x64x32xbf16> to vector<64x32xbf16>
    %c1_111 = arith.constant 1 : index
    %c0_112 = arith.constant 0 : index
    %c0_113 = arith.constant 0 : index
    %238 = vector.load %arg14[%c1_111, %c0_112, %c0_113] : memref<2x1x32xf32, #tpu.memory_space<vmem>>, vector<1x1x32xf32>
    %239 = vector.shape_cast %238 : vector<1x1x32xf32> to vector<1x32xf32>
    %240 = arith.truncf %235 : vector<16x64xf32> to vector<16x64xbf16>
    %cst_114 = arith.constant dense<0.000000e+00> : vector<16x32xf32>
    %241 = tpu.matmul %240, %237, %cst_114 {dimension_numbers = #tpu.dot_dimension_numbers<[1], [0], [0], [1], [0, 0, 1, 1], [], []>} : vector<16x64xbf16>, vector<64x32xbf16>, vector<16x32xf32> -> vector<16x32xf32>
    %242 = vector.broadcast %239 : vector<1x32xf32> to vector<16x32xf32>
    %243 = arith.addf %241, %242 : vector<16x32xf32>
    %244 = arith.addf %243, %214 : vector<16x32xf32>
    %c1_115 = arith.constant 1 : index
    %c0_116 = arith.constant 0 : index
    %c0_117 = arith.constant 0 : index
    %245 = vector.load %arg15[%c1_115, %c0_116, %c0_117] : memref<2x1x32xf32, #tpu.memory_space<vmem>>, vector<1x1x32xf32>
    %246 = vector.shape_cast %245 : vector<1x1x32xf32> to vector<1x32xf32>
    %c1_118 = arith.constant 1 : index
    %c0_119 = arith.constant 0 : index
    %c0_120 = arith.constant 0 : index
    %247 = vector.load %arg16[%c1_118, %c0_119, %c0_120] : memref<2x1x32xf32, #tpu.memory_space<vmem>>, vector<1x1x32xf32>
    %248 = vector.shape_cast %247 : vector<1x1x32xf32> to vector<1x32xf32>
    %cst_121 = arith.constant dense<0.000000e+00> : vector<16xf32>
    %249 = vector.multi_reduction <add>, %244, %cst_121 [1] : vector<16x32xf32> to vector<16xf32>
    %250 = vector.shape_cast %249 : vector<16xf32> to vector<16x1xf32>
    %cst_122 = arith.constant 3.200000e+01 : f32
    %251 = vector.broadcast %cst_122 : f32 to vector<16x1xf32>
    %252 = arith.divf %250, %251 : vector<16x1xf32>
    %253 = vector.broadcast %252 : vector<16x1xf32> to vector<16x32xf32>
    %254 = arith.subf %244, %253 : vector<16x32xf32>
    %255 = arith.mulf %254, %254 : vector<16x32xf32>
    %cst_123 = arith.constant dense<0.000000e+00> : vector<16xf32>
    %256 = vector.multi_reduction <add>, %255, %cst_123 [1] : vector<16x32xf32> to vector<16xf32>
    %257 = vector.shape_cast %256 : vector<16xf32> to vector<16x1xf32>
    %cst_124 = arith.constant 3.200000e+01 : f32
    %258 = vector.broadcast %cst_124 : f32 to vector<16x1xf32>
    %259 = arith.divf %257, %258 : vector<16x1xf32>
    %cst_125 = arith.constant 9.99999996E-13 : f32
    %260 = vector.broadcast %cst_125 : f32 to vector<16x1xf32>
    %261 = arith.addf %259, %260 : vector<16x1xf32>
    %262 = math.rsqrt %261 : vector<16x1xf32>
    %263 = vector.broadcast %262 : vector<16x1xf32> to vector<16x32xf32>
    %264 = arith.mulf %254, %263 : vector<16x32xf32>
    %265 = vector.broadcast %246 : vector<1x32xf32> to vector<16x32xf32>
    %266 = arith.mulf %264, %265 : vector<16x32xf32>
    %267 = vector.broadcast %248 : vector<1x32xf32> to vector<16x32xf32>
    %268 = arith.addf %266, %267 : vector<16x32xf32>
    %269 = vector.extract_strided_slice %268 {offsets = [0, 0], sizes = [1, 32], strides = [1, 1]} : vector<16x32xf32> to vector<1x32xf32>
    %270 = vector.extract_strided_slice %268 {offsets = [8, 0], sizes = [1, 32], strides = [1, 1]} : vector<16x32xf32> to vector<1x32xf32>
    %271 = tpu.concatenate %269, %270 in 0 : vector<1x32xf32>, vector<1x32xf32> -> vector<2x32xf32>
    %c0_126 = arith.constant 0 : index
    %c0_127 = arith.constant 0 : index
    %272 = vector.load %arg17[%c0_126, %c0_127] : memref<32x32xbf16, #tpu.memory_space<vmem>>, vector<32x32xbf16>
    %c0_128 = arith.constant 0 : index
    %c0_129 = arith.constant 0 : index
    %273 = vector.load %arg18[%c0_128, %c0_129] : memref<1x32xf32, #tpu.memory_space<vmem>>, vector<1x32xf32>
    %274 = arith.truncf %271 : vector<2x32xf32> to vector<2x32xbf16>
    %cst_130 = arith.constant dense<0.000000e+00> : vector<2x32xf32>
    %275 = tpu.matmul %274, %272, %cst_130 {dimension_numbers = #tpu.dot_dimension_numbers<[1], [0], [0], [1], [0, 0, 1, 1], [], []>} : vector<2x32xbf16>, vector<32x32xbf16>, vector<2x32xf32> -> vector<2x32xf32>
    %276 = vector.broadcast %273 : vector<1x32xf32> to vector<2x32xf32>
    %277 = arith.addf %275, %276 : vector<2x32xf32>
    %278 = math.tanh %277 : vector<2x32xf32>
    %c0_131 = arith.constant 0 : index
    %c0_132 = arith.constant 0 : index
    %279 = vector.load %arg19[%c0_131, %c0_132] : memref<32x128xbf16, #tpu.memory_space<vmem>>, vector<32x128xbf16>
    %c0_133 = arith.constant 0 : index
    %c0_134 = arith.constant 0 : index
    %280 = vector.load %arg20[%c0_133, %c0_134] : memref<1x128xf32, #tpu.memory_space<vmem>>, vector<1x128xf32>
    %281 = arith.truncf %278 : vector<2x32xf32> to vector<2x32xbf16>
    %cst_135 = arith.constant dense<0.000000e+00> : vector<2x128xf32>
    %282 = tpu.matmul %281, %279, %cst_135 {dimension_numbers = #tpu.dot_dimension_numbers<[1], [0], [0], [1], [0, 0, 1, 1], [], []>} : vector<2x32xbf16>, vector<32x128xbf16>, vector<2x128xf32> -> vector<2x128xf32>
    %283 = vector.broadcast %280 : vector<1x128xf32> to vector<2x128xf32>
    %284 = arith.addf %282, %283 : vector<2x128xf32>
    %c0_136 = arith.constant 0 : index
    %c0_137 = arith.constant 0 : index
    %285 = vector.load %arg21[%c0_136, %c0_137] : memref<2x128xf32, #tpu.memory_space<vmem>>, vector<2x128xf32>
    tpu.vector_store %arg21[%c0_136, %c0_137], %284 {strides = array<i32>} : memref<2x128xf32, #tpu.memory_space<vmem>>, vector<2x128xf32>,
    return
  }
  func.func @transform_0(%arg0: i32) -> (i32, i32) {
    %c0_i32 = arith.constant 0 : i32
    %c0_i32_0 = arith.constant 0 : i32
    %c0_i32_1 = arith.constant 0 : i32
    return %c0_i32, %c0_i32_0 : i32, i32
  }
  func.func @transform_1(%arg0: i32) -> (i32, i32) {
    %c0_i32 = arith.constant 0 : i32
    %c0_i32_0 = arith.constant 0 : i32
    %c0_i32_1 = arith.constant 0 : i32
    return %c0_i32, %c0_i32_0 : i32, i32
  }
  func.func @transform_2(%arg0: i32) -> (i32, i32) {
    %c0_i32 = arith.constant 0 : i32
    %c0_i32_0 = arith.constant 0 : i32
    %c0_i32_1 = arith.constant 0 : i32
    return %c0_i32, %c0_i32_0 : i32, i32
  }
  func.func @transform_3(%arg0: i32) -> (i32, i32) {
    %c0_i32 = arith.constant 0 : i32
    %c0_i32_0 = arith.constant 0 : i32
    %c0_i32_1 = arith.constant 0 : i32
    return %c0_i32, %c0_i32_0 : i32, i32
  }
  func.func @transform_4(%arg0: i32) -> (i32, i32, i32) {
    %c0_i32 = arith.constant 0 : i32
    %c0_i32_0 = arith.constant 0 : i32
    %c0_i32_1 = arith.constant 0 : i32
    %c0_i32_2 = arith.constant 0 : i32
    return %c0_i32, %c0_i32_0, %c0_i32_1 : i32, i32, i32
  }
  func.func @transform_5(%arg0: i32) -> (i32, i32, i32) {
    %c0_i32 = arith.constant 0 : i32
    %c0_i32_0 = arith.constant 0 : i32
    %c0_i32_1 = arith.constant 0 : i32
    %c0_i32_2 = arith.constant 0 : i32
    return %c0_i32, %c0_i32_0, %c0_i32_1 : i32, i32, i32
  }
  func.func @transform_6(%arg0: i32) -> (i32, i32, i32) {
    %c0_i32 = arith.constant 0 : i32
    %c0_i32_0 = arith.constant 0 : i32
    %c0_i32_1 = arith.constant 0 : i32
    %c0_i32_2 = arith.constant 0 : i32
    return %c0_i32, %c0_i32_0, %c0_i32_1 : i32, i32, i32
  }
  func.func @transform_7(%arg0: i32) -> (i32, i32, i32) {
    %c0_i32 = arith.constant 0 : i32
    %c0_i32_0 = arith.constant 0 : i32
    %c0_i32_1 = arith.constant 0 : i32
    %c0_i32_2 = arith.constant 0 : i32
    return %c0_i32, %c0_i32_0, %c0_i32_1 : i32, i32, i32
  }
  func.func @transform_8(%arg0: i32) -> (i32, i32, i32) {
    %c0_i32 = arith.constant 0 : i32
    %c0_i32_0 = arith.constant 0 : i32
    %c0_i32_1 = arith.constant 0 : i32
    %c0_i32_2 = arith.constant 0 : i32
    return %c0_i32, %c0_i32_0, %c0_i32_1 : i32, i32, i32
  }
  func.func @transform_9(%arg0: i32) -> (i32, i32, i32) {
    %c0_i32 = arith.constant 0 : i32
    %c0_i32_0 = arith.constant 0 : i32
    %c0_i32_1 = arith.constant 0 : i32
    %c0_i32_2 = arith.constant 0 : i32
    return %c0_i32, %c0_i32_0, %c0_i32_1 : i32, i32, i32
  }
  func.func @transform_10(%arg0: i32) -> (i32, i32, i32) {
    %c0_i32 = arith.constant 0 : i32
    %c0_i32_0 = arith.constant 0 : i32
    %c0_i32_1 = arith.constant 0 : i32
    %c0_i32_2 = arith.constant 0 : i32
    return %c0_i32, %c0_i32_0, %c0_i32_1 : i32, i32, i32
  }
  func.func @transform_11(%arg0: i32) -> (i32, i32, i32) {
    %c0_i32 = arith.constant 0 : i32
    %c0_i32_0 = arith.constant 0 : i32
    %c0_i32_1 = arith.constant 0 : i32
    %c0_i32_2 = arith.constant 0 : i32
    return %c0_i32, %c0_i32_0, %c0_i32_1 : i32, i32, i32
  }
  func.func @transform_12(%arg0: i32) -> (i32, i32, i32) {
    %c0_i32 = arith.constant 0 : i32
    %c0_i32_0 = arith.constant 0 : i32
    %c0_i32_1 = arith.constant 0 : i32
    %c0_i32_2 = arith.constant 0 : i32
    return %c0_i32, %c0_i32_0, %c0_i32_1 : i32, i32, i32
  }
  func.func @transform_13(%arg0: i32) -> (i32, i32, i32) {
    %c0_i32 = arith.constant 0 : i32
    %c0_i32_0 = arith.constant 0 : i32
    %c0_i32_1 = arith.constant 0 : i32
    %c0_i32_2 = arith.constant 0 : i32
    return %c0_i32, %c0_i32_0, %c0_i32_1 : i32, i32, i32
  }
  func.func @transform_14(%arg0: i32) -> (i32, i32, i32) {
    %c0_i32 = arith.constant 0 : i32
    %c0_i32_0 = arith.constant 0 : i32
    %c0_i32_1 = arith.constant 0 : i32
    %c0_i32_2 = arith.constant 0 : i32
    return %c0_i32, %c0_i32_0, %c0_i32_1 : i32, i32, i32
  }
  func.func @transform_15(%arg0: i32) -> (i32, i32, i32) {
    %c0_i32 = arith.constant 0 : i32
    %c0_i32_0 = arith.constant 0 : i32
    %c0_i32_1 = arith.constant 0 : i32
    %c0_i32_2 = arith.constant 0 : i32
    return %c0_i32, %c0_i32_0, %c0_i32_1 : i32, i32, i32
  }
  func.func @transform_16(%arg0: i32) -> (i32, i32) {
    %c0_i32 = arith.constant 0 : i32
    %c0_i32_0 = arith.constant 0 : i32
    %c0_i32_1 = arith.constant 0 : i32
    return %c0_i32, %c0_i32_0 : i32, i32
  }
  func.func @transform_17(%arg0: i32) -> (i32, i32) {
    %c0_i32 = arith.constant 0 : i32
    %c0_i32_0 = arith.constant 0 : i32
    %c0_i32_1 = arith.constant 0 : i32
    return %c0_i32, %c0_i32_0 : i32, i32
  }
  func.func @transform_18(%arg0: i32) -> (i32, i32) {
    %c0_i32 = arith.constant 0 : i32
    %c0_i32_0 = arith.constant 0 : i32
    %c0_i32_1 = arith.constant 0 : i32
    return %c0_i32, %c0_i32_0 : i32, i32
  }
  func.func @transform_19(%arg0: i32) -> (i32, i32) {
    %c0_i32 = arith.constant 0 : i32
    %c0_i32_0 = arith.constant 0 : i32
    %c0_i32_1 = arith.constant 0 : i32
    return %c0_i32, %c0_i32_0 : i32, i32
  }
  func.func @transform_20(%arg0: i32) -> (i32, i32) {
    %c0_i32 = arith.constant 0 : i32
    %c0_i32_0 = arith.constant 0 : i32
    %c0_i32_1 = arith.constant 0 : i32
    return %c0_i32, %c0_i32_0 : i32, i32
  }
}

</mosaic_0001>

<bundles_post_ra>
// kernel: tpu_custom_call.1
= control target key start
LH: loop header
LB: loop body
LE: loop exit
PB: predicated region body
PF: predicated region fallthrough
CT: control target
= control target key end

     0   :  { %s3848_s0 = inlined_call_operand.vmem [shape: f32[16,32], index: 0, kind: input, shape index: {}]   ;;  %s3849_s1 = inlined_call_operand.vmem [shape: f32[16,16], index: 1, kind: input, shape index: {}]   ;;  %s3850_s2 = inlined_call_operand.vmem [shape: f32[1,32], index: 2, kind: input, shape index: {}]   ;;  %s3851_s3 = inlined_call_operand.vmem [shape: f32[1,32], index: 3, kind: input, shape index: {}]   ;;  %s3852_s4 = inlined_call_operand.vmem [shape: bf16[2,96,32], index: 4, kind: input, shape index: {}]   ;;  %s3853_s5 = inlined_call_operand.vmem [shape: f32[2,96,1], index: 5, kind: input, shape index: {}]   ;;  %s3854_s6 = inlined_call_operand.vmem [shape: bf16[2,32,32], index: 6, kind: input, shape index: {}]   ;;  %s3855_s7 = inlined_call_operand.vmem [shape: f32[2,1,32], index: 7, kind: input, shape index: {}]   ;;  %s3856_s8 = inlined_call_operand.vmem [shape: f32[2,1,32], index: 8, kind: input, shape index: {}]   ;;  %s3857_s9 = inlined_call_operand.vmem [shape: f32[2,1,32], index: 9, kind: input, shape index: {}]   ;;  %s3858_s10 = inlined_call_operand.vmem [shape: bf16[2,32,64], index: 10, kind: input, shape index: {}]   ;;  %s3859_s11 = inlined_call_operand.vmem [shape: f32[2,1,64], index: 11, kind: input, shape index: {}]   ;;  %s3860_s12 = inlined_call_operand.vmem [shape: bf16[2,64,32], index: 12, kind: input, shape index: {}]   ;;  %s3861_s13 = inlined_call_operand.vmem [shape: f32[2,1,32], index: 13, kind: input, shape index: {}]   ;;  %s3862_s14 = inlined_call_operand.vmem [shape: f32[2,1,32], index: 14, kind: input, shape index: {}]   ;;  %s3863_s15 = inlined_call_operand.vmem [shape: f32[2,1,32], index: 15, kind: input, shape index: {}]   ;;  %s3864_s16 = inlined_call_operand.vmem [shape: bf16[32,32], index: 16, kind: input, shape index: {}]   ;;  %s3865_s17 = inlined_call_operand.vmem [shape: f32[1,32], index: 17, kind: input, shape index: {}]   ;;  %s3866_s18 = inlined_call_operand.vmem [shape: bf16[32,128], index: 18, kind: input, shape index: {}]   ;;  %s3867_s19 = inlined_call_operand.vmem [shape: f32[1,128], index: 19, kind: input, shape index: {}]   ;;  %s3868_s20 = inlined_call_operand.hbm [shape: f32[2,128], index: 20, kind: output, shape index: {}]  }
   0x1   :  { %3872 = sst [smem:[#allocation5_spill]] %s3848_s0 }
   0x2   :  { %3873 = sst [smem:[#allocation6_spill]] %s3849_s1 }
   0x3   :  { %3874 = sst [smem:[#allocation7_spill]] %s3850_s2 }
   0x4   :  { %3875 = sst [smem:[#allocation8_spill]] %s3851_s3 }
   0x5   :  { %3876 = sst [smem:[#allocation9_spill]] %s3852_s4 }
   0x6   :  { %s3877_s23 = sld [smem:[#allocation5_spill]]  ;;  %vm73_vm0 = vcmask 261120  }
   0xc   :  { %v69_v0 = vld [vmem:[%s3877_s23] sm:$0xff]  ;;  %v70_v1 = vld [vmem:[%s3877_s23 + $0x8] sm:$0xff] }
   0xd   :  { %v74_v2 = vsel %vm73_vm0, %v69_v0, 0.0  ;;  %v77_v3 = vsel %vm73_vm0, %v70_v1, 0.0 }
   0xe   :  { %75 = vadd.xlane.f32.xlu0 %v74_v2 }
  0x12   :  { %78 = vadd.xlane.f32.xlu0 %v77_v3 }
  0x13   :  { %25 = vsyncpa [#allocation3], 0  ;;  %s3878_s26 = sld [smem:[#allocation9_spill]]  ;;  %v131_v15 = vld [vmem:[%s3853_s5 + $0x8] sm:$0xff]  ;;  %v3227_v16 = vmov 0   ;;  %v130_v17 = vld [vmem:[%s3853_s5] sm:$0xff] }
  0x14   :  { %3064 = vset.pattern.permute.xlu1 %v3227_v16  ;;  %3063 = vset.pattern.permute.xlu0 %v3227_v16  ;;  %v132_v18 = vld [vmem:[%s3853_s5 + $0x10] sm:$0xff]  ;;  %v133_v19 = vld [vmem:[%s3853_s5 + $0x18] sm:$0xff]  ;;  %v134_v20 = vld [vmem:[%s3853_s5 + $0x20] sm:$0xff]  ;;  %s3879_s30 = sld [smem:[#allocation7_spill]]  ;;  %s3880_s1 = sld [smem:[#allocation8_spill]]  ;;  %v3228_v45 = vmov 0.0  }
  0x15   :  { %v135_v21 = vld [vmem:[%s3853_s5 + $0x28] sm:$0xff]  ;;  %v136_v22 = vld [vmem:[%s3853_s5 + $0x30] sm:$0xff]  ;;  %v137_v23 = vld [vmem:[%s3853_s5 + $0x38] sm:$0xff]  ;;  %2875 = vmatprep.subr.bf16.mxu1 %v3228_v45  ;;  %vm3229_vm1 = vmmov 0   ;;  %vm474_vm2 = vcmask 1043456   ;;  %vm470_vm3 = vcmask 64512  }
  0x16   :  { %2877 = vmatprep.mubr.msk.bf16.mxu1 %vm3229_vm1, %v3228_v45  ;;  %s3881_s21 = sld [smem:[#allocation6_spill]]  ;;  %vm660_vm4 = vcmask 130048   ;;  %vm1213_vm5 = vcmask 523264   ;;  %vm2502_vm6 = vcmask 1040384  }
  0x19   :  { %v3077_v14 = vld [vmem:[%s3878_s26] sm:$0xff]   ;;  %v3078_v42 = vld [vmem:[%s3878_s26 + $0x8] sm:$0xff]   ;;  %v3079_v43 = vld [vmem:[%s3878_s26 + $0x10] sm:$0xff]  }
  0x1a   :  { %2863 = vmatprep.mubr.msk.bf16.mxu0 %vm73_vm0, %v3077_v14  ;;  %v2654_v32 = vld [vmem:[%s3879_s30] ss:$0 sm:$0xff]  ;;  %v3080_v44 = vld [vmem:[%s3878_s26 + $0x18] sm:$0xff]  }
  0x1b   :  { %v2655_v36 = vld [vmem:[%s3880_s1] ss:$0 sm:$0xff] }
  0x28   :  { %144 = vperm.xlu0 %3063, %v130_v17  }
  0x9b   :  { %v76_v4 = vpop.xlane.xlu0 %75 }
  0x9c   :  { %v81_v5 = vmul.f32 0.03125, %v76_v4 }
  0x9e   :  { %v83_v6 = vsub.f32 %v69_v0, %v81_v5 }
  0x9f   :  { %v79_v7 = vpop.xlane.xlu0 %78 }
  0xa0   :  { %v82_v8 = vmul.f32 0.03125, %v79_v7  ;;  %v85_v9 = vmul.f32 %v83_v6, %v83_v6 }
  0xa2   :  { %v84_v10 = vsub.f32 %v70_v1, %v82_v8  ;;  %v87_v11 = vsel %vm73_vm0, %v85_v9, 0.0 }
  0xa3   :  { %88 = vadd.xlane.f32.xlu1 %v87_v11 }
  0xa4   :  { %v86_v12 = vmul.f32 %v84_v10, %v84_v10 }
  0xa6   :  { %v90_v13 = vsel %vm73_vm0, %v86_v12, 0.0 }
  0xa7   :  { %91 = vadd.xlane.f32.xlu1 %v90_v13  ;;  %v145_v48 = vpop.permute.xlu0 %144 }
  0xb8   :  { %149 = vperm.xlu1 %3064, %v131_v15  }
  0xbc   :  { %154 = vperm.xlu1 %3064, %v132_v18  }
  0xc0   :  { %159 = vperm.xlu1 %3064, %v133_v19  }
  0xc4   :  { %164 = vperm.xlu1 %3064, %v134_v20  }
  0xc8   :  { %169 = vperm.xlu1 %3064, %v135_v21  }
  0xcc   :  { %174 = vperm.xlu1 %3064, %v136_v22  }
  0xd0   :  { %179 = vperm.xlu1 %3064, %v137_v23  }
 0x130   :  { %v89_v24 = vpop.xlane.xlu1 %88 }
 0x131   :  { %v93_v25 = vmul.f32 0.03125, %v89_v24 }
 0x133   :  { %v95_v26 = vadd.f32 1e-12, %v93_v25 }
 0x134   :  { %v92_v27 = vpop.xlane.xlu1 %91 }
 0x135   :  { %3109 = vrsqrt.f32 %v95_v26  ;;  %v94_v28 = vmul.f32 0.03125, %v92_v27  ;;  %v3081_v26 = vld [vmem:[%s3878_s26 + $0x20] sm:$0xff]   ;;  %v3082_v27 = vld [vmem:[%s3878_s26 + $0x28] sm:$0xff]  }
 0x137   :  { %v96_v29 = vadd.f32 1e-12, %v94_v28  ;;  %v3437_v28 = vld [vmem:[%s3881_s21] sm:$0xff] }
 0x138   :  { %v150_v46 = vpop.permute.xlu1 %149 }
 0x139   :  { %3111 = vrsqrt.f32 %v96_v29 }
 0x13c   :  { %v155_v47 = vpop.permute.xlu1 %154 }
 0x13f   :  { %v3110_v30 = vpop.eup %3109 }
 0x140   :  { %v99_v31 = vmul.f32 %v3110_v30, %v83_v6  ;;  %v160_v53 = vpop.permute.xlu1 %159  ;;  %v3442_v30 = vld [vmem:[%s3881_s21 + $0x8] sm:$0xff] }
 0x142   :  { %v107_v35 = vmul.f32 %v2654_v32, %v99_v31 }
 0x143   :  { %v3112_v33 = vpop.eup %3111 }
 0x144   :  { %v100_v34 = vmul.f32 %v3112_v33, %v84_v10  ;;  %v3380_v38 = vadd.f32 %v2655_v36, %v107_v35  ;;  %v165_v57 = vpop.permute.xlu1 %164 }
 0x146   :  { %v108_v37 = vmul.f32 %v2654_v32, %v100_v34 }
 0x148   :  { %v3382_v39 = vadd.f32 %v2655_v36, %v108_v37  ;;  %v170_v2 = vpop.permute.xlu1 %169 }
 0x14a   :  { %v129_v40 = vpack.c.bf16 %v3382_v39, %v3380_v38 }
 0x14c   :  { %3057 = vmatprep.subr.msk.bf16.mxu0 %vm73_vm0, %v129_v40  ;;  %v251_v41 = vsel %vm73_vm0, %v129_v40, 0  ;;  %v175_v3 = vpop.permute.xlu1 %174 }
 0x14d   :  { %2862 = vmatpush3.bf16.xpose.msra.mxu0 %v251_v41 }
 0x14e   :  { %2899 = vmatprep.subr.bf16.mxu0 %v3228_v45 }
 0x150   :  { %v180_v4 = vpop.permute.xlu1 %179 }
 0x154   :  { %2864 = vmatmul.mubr.msk.bf16.vlgmr.msra.gmra.mrb[0].mxu0 %vm73_vm0, %v3078_v42 }
 0x155   :  { %2867 = vmatprep.mubr.msk.bf16.mxu0 %vm73_vm0, %v3079_v43 }
 0x15c   :  { %2868 = vmatmul.mubr.msk.bf16.gmra.mrb[4].mxu0 %vm73_vm0, %v3080_v44 }
 0x15d   :  { %2871 = vmatprep.mubr.msk.bf16.mxu0 %vm73_vm0, %v3081_v26 }
 0x164   :  { %2872 = vmatmul.mubr.msk.bf16.gmra.mrb[8].mxu0 %vm73_vm0, %v3082_v27 }
 0x165   :  { %2901 = vmatprep.mubr.msk.bf16.mxu0 %vm3229_vm1, %v3228_v45 }
 0x227   :  { %v2865_v49 = vpop.f32.mrb[0].mxu0 }
 0x228   :  { %v287_v50 = vpop.f32.mrb[1].mxu0  ;;  %v296_v58 = vadd.f32 %v2865_v49, %v155_v47 }
 0x229   :  { %v288_v51 = vadd.f32 %v287_v50, %v145_v48  ;;  %v2866_v52 = vpop.f32.mrb[2].mxu0 }
 0x22a   :  { %v290_v54 = vpop.f32.mrb[3].mxu0  ;;  %v299_v0 = vadd.f32 %v2866_v52, %v160_v53 }
 0x22b   :  { %v291_v55 = vadd.f32 %v290_v54, %v150_v46  ;;  %334 = vxpose.xlu1.b32.start.end [1/1] (short) (narrow) %v288_v51, 16 }
 0x22d   :  { %366 = vxpose.xlu0.b32.start.end [1/1] (short) (narrow) %v291_v55, 16 }
 0x22f   :  { %v2869_v56 = vpop.f32.mrb[4].mxu0 }
 0x230   :  { %v303_v59 = vpop.f32.mrb[5].mxu0  ;;  %v312_v12 = vadd.f32 %v2869_v56, %v175_v3 }
 0x231   :  { %v304_v60 = vadd.f32 %v303_v59, %v165_v57  ;;  %v2870_v61 = vpop.f32.mrb[6].mxu0 }
 0x232   :  { %v306_v62 = vpop.f32.mrb[7].mxu0  ;;  %398 = vxpose.xlu0.b32.start.end [1/1] (short) (narrow) %v296_v58, 16  ;;  %v468_v15 = vpack.c.bf16 %v312_v12, %v312_v12  ;;  %v315_v19 = vadd.f32 %v2870_v61, %v180_v4 }
 0x233   :  { %v466_v63 = vpack.c.bf16 %v304_v60, %v304_v60  ;;  %v307_v5 = vadd.f32 %v306_v62, %v170_v2 }
 0x234   :  { %v570_v18 = vsel %vm474_vm2, %v468_v15, 0  ;;  %v469_v21 = vpack.c.bf16 %v315_v19, %v315_v19 }
 0x235   :  { %v476_v1 = vsel %vm474_vm2, %v466_v63, 0  ;;  %v467_v8 = vpack.c.bf16 %v307_v5, %v307_v5 }
 0x236   :  { %2876 = vmatpush3.bf16.msra.mxu1 %v476_v1  ;;  %v617_v23 = vsel %vm474_vm2, %v469_v21, 0 }
 0x237   :  { %430 = vxpose.xlu0.b32.start.end [1/1] (short) (narrow) %v299_v0, 16  ;;  %2881 = vmatprep.subr.bf16.mxu1 %v3228_v45  ;;  %v523_v13 = vsel %vm474_vm2, %v467_v8, 0 }
 0x2ab   :  { %v350_v6 = vpop.trf.xlu1 }
 0x2ad   :  { %v382_v7 = vpop.trf.xlu0 }
 0x2af   :  { %v351_v9 = vpop.trf.xlu1 }
 0x2b0   :  { %v462_v10 = vpack.c.bf16 %v351_v9, %v350_v6 }
 0x2b1   :  { %v383_v11 = vpop.trf.xlu0 }
 0x2b2   :  { %2878 = vmatmul.mubr.msk.bf16.vlgmr.msra.gmra.mrb[0].mxu1 %vm470_vm3, %v462_v10  ;;  %v463_v16 = vpack.c.bf16 %v383_v11, %v382_v7 }
 0x2b3   :  { %2882 = vmatpush3.bf16.msra.mxu1 %v523_v13  ;;  %2883 = vmatprep.mubr.msk.bf16.mxu1 %vm3229_vm1, %v3228_v45 }
 0x2b4   :  { %2887 = vmatprep.subr.bf16.mxu1 %v3228_v45 }
 0x2b5   :  { %v414_v14 = vpop.trf.xlu0 }
 0x2b9   :  { %v415_v17 = vpop.trf.xlu0 }
 0x2ba   :  { %2884 = vmatmul.mubr.msk.bf16.vlgmr.msra.gmra.mrb[4].mxu1 %vm470_vm3, %v463_v16  ;;  %v464_v22 = vpack.c.bf16 %v415_v17, %v414_v14 }
 0x2bb   :  { %2888 = vmatpush3.bf16.msra.mxu1 %v570_v18  ;;  %2889 = vmatprep.mubr.msk.bf16.mxu1 %vm3229_vm1, %v3228_v45 }
 0x2bc   :  { %2893 = vmatprep.subr.bf16.mxu1 %v3228_v45 }
 0x2bd   :  { %v446_v20 = vpop.trf.xlu0 }
 0x2c1   :  { %v447_v24 = vpop.trf.xlu0 }
 0x2c2   :  { %2890 = vmatmul.mubr.msk.bf16.vlgmr.msra.gmra.mrb[8].mxu1 %vm470_vm3, %v464_v22  ;;  %v465_v25 = vpack.c.bf16 %v447_v24, %v446_v20 }
 0x2c3   :  { %2894 = vmatpush3.bf16.msra.mxu1 %v617_v23  ;;  %2895 = vmatprep.mubr.msk.bf16.mxu1 %vm3229_vm1, %v3228_v45 }
 0x2c4   :  { %2905 = vmatprep.subr.bf16.mxu1 %v3228_v45 }
 0x2ca   :  { %2896 = vmatmul.mubr.msk.bf16.vlgmr.msra.gmra.mrb[12].mxu1 %vm470_vm3, %v465_v25 }
 0x2cb   :  { %2907 = vmatprep.mubr.msk.bf16.mxu1 %vm3229_vm1, %v3228_v45 }
 0x385   :  { %v512_v29 = vpop.f32.mrb[0].mxu1 }
 0x386   :  { %v513_v31 = vadd.f32 %v512_v29, %v3437_v28  ;;  %v2879_v32 = vpop.f32.mrb[1].mxu1 }
 0x387   :  { %v515_v33 = vpop.f32.mrb[2].mxu1 }
 0x388   :  { %v516_v34 = vadd.f32 %v515_v33, %v3442_v30  ;;  %v2880_v35 = vpop.f32.mrb[3].mxu1  ;;  %v661_v36 = vsel %vm660_vm4, %v513_v31, -inf }
 0x389   :  { %662 = vmax.xlane.f32.xlu1 %v661_v36 }
 0x38a   :  { %v664_v37 = vsel %vm660_vm4, %v516_v34, -inf }
 0x38b   :  { %665 = vmax.xlane.f32.xlu0 %v664_v37 }
 0x38d   :  { %v559_v40 = vpop.f32.mrb[4].mxu1 }
 0x38e   :  { %v560_v41 = vadd.f32 %v559_v40, %v3437_v28  ;;  %v2885_v42 = vpop.f32.mrb[5].mxu1  ;;  %v139_v40 = vld [vmem:[%s3853_s5 + $0x48] sm:$0xff] }
 0x38f   :  { %v562_v43 = vpop.f32.mrb[6].mxu1 }
 0x390   :  { %v563_v44 = vadd.f32 %v562_v43, %v3442_v30  ;;  %v2886_v46 = vpop.f32.mrb[7].mxu1  ;;  %v667_v47 = vsel %vm660_vm4, %v560_v41, -inf }
 0x391   :  { %668 = vmax.xlane.f32.xlu1 %v667_v47  ;;  %v140_v46 = vld [vmem:[%s3853_s5 + $0x50] sm:$0xff]  ;;  %v138_v47 = vld [vmem:[%s3853_s5 + $0x40] sm:$0xff] }
 0x392   :  { %v670_v48 = vsel %vm660_vm4, %v563_v44, -inf }
 0x395   :  { %v606_v49 = vpop.f32.mrb[8].mxu1  ;;  %671 = vmax.xlane.f32.xlu1 %v670_v48 }
 0x396   :  { %v607_v50 = vadd.f32 %v606_v49, %v3437_v28  ;;  %v2891_v51 = vpop.f32.mrb[9].mxu1 }
 0x397   :  { %v609_v52 = vpop.f32.mrb[10].mxu1 }
 0x398   :  { %v610_v53 = vadd.f32 %v609_v52, %v3442_v30  ;;  %v2892_v54 = vpop.f32.mrb[11].mxu1  ;;  %v673_v55 = vsel %vm660_vm4, %v607_v50, -inf }
 0x399   :  { %674 = vmax.xlane.f32.xlu0 %v673_v55 }
 0x39a   :  { %v676_v56 = vsel %vm660_vm4, %v610_v53, -inf }
 0x39b   :  { %677 = vmax.xlane.f32.xlu1 %v676_v56 }
 0x39d   :  { %v653_v57 = vpop.f32.mrb[12].mxu1 }
 0x39e   :  { %v654_v58 = vadd.f32 %v653_v57, %v3437_v28  ;;  %v2897_v59 = vpop.f32.mrb[13].mxu1 }
 0x39f   :  { %v656_v60 = vpop.f32.mrb[14].mxu1 }
 0x3a0   :  { %v3458_v61 = vadd.f32 %v656_v60, %v3442_v30  ;;  %v679_v62 = vsel %vm660_vm4, %v654_v58, -inf  ;;  %v2898_v63 = vpop.f32.mrb[15].mxu1 }
 0x3a1   :  { %680 = vmax.xlane.f32.xlu0 %v679_v62 }
 0x3a2   :  { %v682_v0 = vsel %vm660_vm4, %v3458_v61, -inf }
 0x3a3   :  { %683 = vmax.xlane.f32.xlu1 %v682_v0 }
 0x416   :  { %v663_v1 = vpop.xlane.xlu1 %662 }
 0x417   :  { %v685_v2 = vsub.f32 %v513_v31, %v663_v1 }
 0x418   :  { %v666_v3 = vpop.xlane.xlu0 %665 }
 0x419   :  { %v693_v4 = vmul.f32 1.442695, %v685_v2  ;;  %v686_v5 = vsub.f32 %v516_v34, %v666_v3 }
 0x41b   :  { %3113 = vpow2.f32 %v693_v4  ;;  %v695_v6 = vmul.f32 1.442695, %v686_v5 }
 0x41d   :  { %3115 = vpow2.f32 %v695_v6 }
 0x41e   :  { %v669_v7 = vpop.xlane.xlu1 %668 }
 0x41f   :  { %v687_v8 = vsub.f32 %v560_v41, %v669_v7  ;;  %v3479_v41 = vpop.f32.mrb[8].mxu0 }
 0x420   :  { %v319_v42 = vpop.f32.mrb[9].mxu0 }
 0x421   :  { %v697_v9 = vmul.f32 1.442695, %v687_v8  ;;  %v3481_v43 = vpop.f32.mrb[10].mxu0 }
 0x422   :  { %v672_v10 = vpop.xlane.xlu1 %671 }
 0x423   :  { %3117 = vpow2.f32 %v697_v9  ;;  %v688_v11 = vsub.f32 %v563_v44, %v672_v10  ;;  %v322_v44 = vpop.f32.mrb[11].mxu0 }
 0x425   :  { %v3463_v12 = vpop.eup %3113  ;;  %v699_v13 = vmul.f32 1.442695, %v688_v11 }
 0x426   :  { %v675_v14 = vpop.xlane.xlu0 %674  ;;  %v709_v15 = vsel %vm660_vm4, %v3463_v12, 0.0 }
 0x427   :  { %v3116_v16 = vpop.eup %3115  ;;  %3119 = vpow2.f32 %v699_v13  ;;  %v689_v17 = vsub.f32 %v607_v50, %v675_v14  ;;  %710 = vadd.xlane.f32.xlu0 %v709_v15 }
 0x428   :  { %v678_v18 = vpop.xlane.xlu1 %677  ;;  %v712_v19 = vsel %vm660_vm4, %v3116_v16, 0.0 }
 0x429   :  { %v701_v20 = vmul.f32 1.442695, %v689_v17  ;;  %v690_v21 = vsub.f32 %v610_v53, %v678_v18  ;;  %713 = vadd.xlane.f32.xlu1 %v712_v19  ;;  %v141_v53 = vld [vmem:[%s3853_s5 + $0x58] sm:$0xff] }
 0x42b   :  { %3121 = vpow2.f32 %v701_v20  ;;  %v703_v22 = vmul.f32 1.442695, %v690_v21 }
 0x42d   :  { %v3118_v23 = vpop.eup %3117  ;;  %3123 = vpow2.f32 %v703_v22 }
 0x42e   :  { %v681_v24 = vpop.xlane.xlu0 %680  ;;  %v715_v25 = vsel %vm660_vm4, %v3118_v23, 0.0 }
 0x42f   :  { %v691_v26 = vsub.f32 %v654_v58, %v681_v24  ;;  %716 = vadd.xlane.f32.xlu0 %v715_v25 }
 0x430   :  { %v684_v48 = vpop.xlane.xlu1 %683 }
 0x431   :  { %v3120_v27 = vpop.eup %3119  ;;  %v705_v29 = vmul.f32 1.442695, %v691_v26  ;;  %v692_v49 = vsub.f32 %v3458_v61, %v684_v48 }
 0x432   :  { %v718_v31 = vsel %vm660_vm4, %v3120_v27, 0.0 }
 0x433   :  { %3125 = vpow2.f32 %v705_v29  ;;  %719 = vadd.xlane.f32.xlu1 %v718_v31  ;;  %v707_v50 = vmul.f32 1.442695, %v692_v49 }
 0x435   :  { %v3122_v32 = vpop.eup %3121  ;;  %3127 = vpow2.f32 %v707_v50 }
 0x436   :  { %v721_v33 = vsel %vm660_vm4, %v3122_v32, 0.0 }
 0x437   :  { %v3124_v34 = vpop.eup %3123  ;;  %722 = vadd.xlane.f32.xlu0 %v721_v33 }
 0x438   :  { %v724_v35 = vsel %vm660_vm4, %v3124_v34, 0.0 }
 0x439   :  { %725 = vadd.xlane.f32.xlu1 %v724_v35 }
 0x43d   :  { %v3472_v36 = vpop.eup %3125 }
 0x43e   :  { %v727_v37 = vsel %vm660_vm4, %v3472_v36, 0.0 }
 0x43f   :  { %728 = vadd.xlane.f32.xlu0 %v727_v37  ;;  %v3490_v51 = vpop.eup %3127 }
 0x440   :  { %v730_v52 = vsel %vm660_vm4, %v3490_v51, 0.0 }
 0x44a   :  { %189 = vperm.xlu1 %3064, %v139_v40  }
 0x44e   :  { %194 = vperm.xlu1 %3064, %v140_v46  }
 0x455   :  { %184 = vperm.xlu0 %3063, %v138_v47  }
 0x472   :  { %731 = vadd.xlane.f32.xlu1 %v730_v52  ;;  %v3084_v52 = vld [vmem:[%s3854_s6 + $0x8] sm:$0xff]  }
 0x483   :  { %199 = vperm.xlu1 %3064, %v141_v53  }
 0x4b4   :  { %v711_v54 = vpop.xlane.xlu0 %710 }
 0x4b5   :  { %3129 = vrcp.f32 %v711_v54 }
 0x4b6   :  { %v714_v55 = vpop.xlane.xlu1 %713 }
 0x4b7   :  { %3131 = vrcp.f32 %v714_v55 }
 0x4bc   :  { %v717_v56 = vpop.xlane.xlu0 %716 }
 0x4bd   :  { %3133 = vrcp.f32 %v717_v56 }
 0x4bf   :  { %v3130_v57 = vpop.eup %3129 }
 0x4c0   :  { %v720_v58 = vpop.xlane.xlu1 %719  ;;  %v741_v60 = vmul.f32 %v3130_v57, %v3463_v12 }
 0x4c1   :  { %v3132_v59 = vpop.eup %3131  ;;  %3135 = vrcp.f32 %v720_v58 }
 0x4c2   :  { %v742_v61 = vmul.f32 %v3132_v59, %v3116_v16 }
 0x4c4   :  { %v723_v62 = vpop.xlane.xlu0 %722  ;;  %v753_v63 = vpack.c.bf16 %v742_v61, %v741_v60  ;;  %v2676_v60 = vld [vmem:[%s3855_s7] ss:$0 sm:$0xff] }
 0x4c5   :  { %3137 = vrcp.f32 %v723_v62 }
 0x4c6   :  { %v726_v0 = vpop.xlane.xlu1 %725  ;;  %v761_v1 = vsel %vm660_vm4, %v753_v63, 0 }
 0x4c7   :  { %3139 = vrcp.f32 %v726_v0  ;;  %2900 = vmatpush3.bf16.xpose.msra.mxu0 %v761_v1  ;;  %v3134_v2 = vpop.eup %3133 }
 0x4c8   :  { %2911 = vmatprep.subr.bf16.mxu0 %v3228_v45  ;;  %v743_v4 = vmul.f32 %v3134_v2, %v3118_v23 }
 0x4ca   :  { %v190_v7 = vpop.permute.xlu1 %189 }
 0x4cb   :  { %v3136_v3 = vpop.eup %3135  ;;  %v323_v12 = vadd.f32 %v322_v44, %v190_v7 }
 0x4cc   :  { %v744_v5 = vmul.f32 %v3136_v3, %v3120_v27  ;;  %v729_v9 = vpop.xlane.xlu0 %728 }
 0x4cd   :  { %v750_v18 = vpack.c.bf16 %v323_v12, %v323_v12  ;;  %3141 = vrcp.f32 %v729_v9 }
 0x4ce   :  { %v754_v6 = vpack.c.bf16 %v744_v5, %v743_v4  ;;  %v195_v20 = vpop.permute.xlu1 %194 }
 0x4cf   :  { %v3138_v8 = vpop.eup %3137  ;;  %v328_v22 = vadd.f32 %v3479_v41, %v195_v20 }
 0x4d0   :  { %v807_v10 = vsel %vm660_vm4, %v754_v6, 0  ;;  %v745_v14 = vmul.f32 %v3138_v8, %v3122_v32 }
 0x4d1   :  { %v3140_v11 = vpop.eup %3139  ;;  %2906 = vmatpush3.bf16.xpose.msra.mxu1 %v807_v10  ;;  %v751_v23 = vpack.c.bf16 %v328_v22, %v328_v22 }
 0x4d2   :  { %v746_v13 = vmul.f32 %v3140_v11, %v3124_v34  ;;  %2917 = vmatprep.subr.bf16.mxu1 %v3228_v45 }
 0x4d4   :  { %v185_v15 = vpop.permute.xlu0 %184  ;;  %v755_v17 = vpack.c.bf16 %v746_v13, %v745_v14 }
 0x4d5   :  { %v320_v16 = vadd.f32 %v319_v42, %v185_v15 }
 0x4d6   :  { %v853_v21 = vsel %vm660_vm4, %v755_v17, 0  ;;  %v3086_v17 = vld [vmem:[%s3858_s10 + $0x8] sm:$0xff]  }
 0x4d7   :  { %v749_v19 = vpack.c.bf16 %v320_v16, %v320_v16  ;;  %v3142_v25 = vpop.eup %3141  ;;  %v3085_v16 = vld [vmem:[%s3858_s10] sm:$0xff]  }
 0x4d8   :  { %2908 = vmatmul.mubr.msk.bf16.vlgmr.msra.gmra.mrb[16].mxu1 %vm660_vm4, %v750_v18  ;;  %v747_v27 = vmul.f32 %v3142_v25, %v3472_v36  ;;  %v3083_v36 = vld [vmem:[%s3854_s6] sm:$0xff]  }
 0x4d9   :  { %2902 = vmatmul.mubr.msk.bf16.vlgmr.msra.gmra.mrb[12].mxu0 %vm660_vm4, %v749_v19  ;;  %2919 = vmatprep.mubr.msk.bf16.mxu1 %vm3229_vm1, %v3228_v45 }
 0x4da   :  { %2912 = vmatpush3.bf16.xpose.msra.mxu0 %v853_v21  ;;  %2913 = vmatprep.mubr.msk.bf16.mxu0 %vm3229_vm1, %v3228_v45 }
 0x4db   :  { %2923 = vmatprep.subr.bf16.mxu0 %v3228_v45 }
 0x4e1   :  { %2914 = vmatmul.mubr.msk.bf16.vlgmr.msra.gmra.mrb[16].mxu0 %vm660_vm4, %v751_v23 }
 0x4e2   :  { %2927 = vmatprep.mubr.msk.bf16.mxu0 %vm3229_vm1, %v3228_v45  ;;  %2924 = vmatpush3.bf16.msra.mxu0 %v3083_v36 }
 0x4e3   :  { %2925 = vmatprep.subr.bf16.mxu0 %v3228_v45 }
 0x4e6   :  { %2926 = vmatpush3.bf16.msra.mxu0 %v3084_v52 }
 0x4e7   :  { %2939 = vmatprep.subr.bf16.mxu0 %v3228_v45 }
 0x4ff   :  { %v732_v24 = vpop.xlane.xlu1 %731 }
 0x500   :  { %3143 = vrcp.f32 %v732_v24 }
 0x503   :  { %v200_v32 = vpop.permute.xlu1 %199 }
 0x504   :  { %v331_v34 = vadd.f32 %v3481_v43, %v200_v32  ;;  %v2681_v32 = vld [vmem:[%s3857_s9] ss:$0 sm:$0xff] }
 0x506   :  { %v752_v35 = vpack.c.bf16 %v331_v34, %v331_v34 }
 0x50a   :  { %v3144_v26 = vpop.eup %3143 }
 0x50b   :  { %v748_v29 = vmul.f32 %v3144_v26, %v3490_v51  ;;  %v2680_v26 = vld [vmem:[%s3856_s8] ss:$0 sm:$0xff] }
 0x50d   :  { %v756_v31 = vpack.c.bf16 %v748_v29, %v747_v27 }
 0x50f   :  { %v899_v33 = vsel %vm660_vm4, %v756_v31, 0 }
 0x510   :  { %2918 = vmatpush3.bf16.xpose.msra.mxu1 %v899_v33 }
 0x511   :  { %2931 = vmatprep.subr.bf16.mxu1 %v3228_v45 }
 0x517   :  { %2920 = vmatmul.mubr.msk.bf16.vlgmr.msra.gmra.mrb[20].mxu1 %vm660_vm4, %v752_v35 }
 0x518   :  { %2935 = vmatprep.mubr.msk.bf16.mxu1 %vm3229_vm1, %v3228_v45  ;;  %2932 = vmatpush3.bf16.msra.mxu1 %v3085_v16 }
 0x519   :  { %2933 = vmatprep.subr.bf16.mxu1 %v3228_v45 }
 0x51c   :  { %2934 = vmatpush3.bf16.msra.mxu1 %v3086_v17 }
 0x5ab   :  { %v843_v37 = vpop.f32.mrb[16].mxu1 }
 0x5ac   :  { %v797_v40 = vpop.f32.mrb[12].mxu0  ;;  %v2909_v41 = vpop.f32.mrb[17].mxu1 }
 0x5ad   :  { %941 = vxpose.xlu0.b32.start [1/4] (short) (narrow) %v797_v40, 16  ;;  %v2903_v42 = vpop.f32.mrb[13].mxu0  ;;  %v846_v43 = vpop.f32.mrb[18].mxu1  ;;  %v3088_v40 = vld [vmem:[%s3860_s12 + $0x8] sm:$0xff]   ;;  %v3089_v41 = vld [vmem:[%s3860_s12 + $0x10] sm:$0xff]  }
 0x5ae   :  { %v800_v44 = vpop.f32.mrb[14].mxu0  ;;  %v2910_v46 = vpop.f32.mrb[19].mxu1  ;;  %v3090_v42 = vld [vmem:[%s3860_s12 + $0x18] sm:$0xff]   ;;  %v2682_v43 = vld [vmem:[%s3859_s11] ss:$0 sm:$0xff] }
 0x5af   :  { %v2904_v47 = vpop.f32.mrb[15].mxu0 }
 0x5b1   :  { %942 = vxpose.xlu0.b32.cont [2/4] (short) (narrow) %v843_v37, 16  ;;  %v3087_v37 = vld [vmem:[%s3860_s12] sm:$0xff]  }
 0x5b4   :  { %v889_v48 = vpop.f32.mrb[16].mxu0 }
 0x5b5   :  { %943 = vxpose.xlu0.b32.cont [3/4] (short) (narrow) %v889_v48, 16  ;;  %v2915_v49 = vpop.f32.mrb[17].mxu0 }
 0x5b6   :  { %v892_v50 = vpop.f32.mrb[18].mxu0 }
 0x5b7   :  { %v2916_v51 = vpop.f32.mrb[19].mxu0 }
 0x5ea   :  { %v935_v53 = vpop.f32.mrb[20].mxu1 }
 0x5eb   :  { %944 = vxpose.xlu0.b32.end [4/4] (short) (narrow) %v935_v53, 16  ;;  %v2921_v54 = vpop.f32.mrb[21].mxu1 }
 0x5ec   :  { %v938_v55 = vpop.f32.mrb[22].mxu1 }
 0x5ed   :  { %v2922_v56 = vpop.f32.mrb[23].mxu1 }
 0x65f   :  { %v957_v57 = vpop.trf.xlu0 }
 0x663   :  { %v958_v58 = vpop.trf.xlu0 }
 0x664   :  { %v978_v59 = vpack.c.bf16 %v958_v58, %v957_v57 }
 0x666   :  { %2928 = vmatmul.mubr.msk.bf16.vlgmr.msra.gmra.mrb[20].mxu0 %vm73_vm0, %v978_v59 }
 0x667   :  { %2947 = vmatprep.mubr.msk.bf16.mxu0 %vm3229_vm1, %v3228_v45  ;;  %2940 = vmatpush3.bf16.msra.mxu0 %v3087_v37 }
 0x668   :  { %2941 = vmatprep.subr.bf16.mxu0 %v3228_v45 }
 0x66b   :  { %2942 = vmatpush3.bf16.msra.mxu0 %v3088_v40 }
 0x66c   :  { %2943 = vmatprep.subr.bf16.mxu0 %v3228_v45 }
 0x66f   :  { %2944 = vmatpush3.bf16.msra.mxu0 %v3089_v41 }
 0x670   :  { %2945 = vmatprep.subr.bf16.mxu0 %v3228_v45 }
 0x673   :  { %2946 = vmatpush3.bf16.msra.mxu0 %v3090_v42 }
 0x674   :  { %2965 = vmatprep.subr.bf16.mxu0 %v3228_v45 }
 0x739   :  { %v1034_v61 = vpop.f32.mrb[20].mxu0 }
 0x73a   :  { %v1035_v62 = vadd.f32 %v2676_v60, %v1034_v61  ;;  %v2929_v63 = vpop.f32.mrb[21].mxu0 }
 0x73b   :  { %v1037_v0 = vpop.f32.mrb[22].mxu0 }
 0x73c   :  { %v1038_v1 = vadd.f32 %v2676_v60, %v1037_v0  ;;  %v2930_v2 = vpop.f32.mrb[23].mxu0  ;;  %v1041_v3 = vadd.f32 %v1035_v62, %v3380_v38 }
 0x73e   :  { %v1045_v4 = vsel %vm73_vm0, %v1041_v3, 0.0  ;;  %v1042_v5 = vadd.f32 %v1038_v1, %v3382_v39  ;;  %v2709_v39 = vld [vmem:[%s3853_s5 + $0x78] sm:$0xff] }
 0x73f   :  { %1046 = vadd.xlane.f32.xlu1 %v1045_v4 }
 0x740   :  { %v1048_v6 = vsel %vm73_vm0, %v1042_v5, 0.0 }
 0x743   :  { %1049 = vadd.xlane.f32.xlu1 %v1048_v6  ;;  %v2686_v6 = vld [vmem:[%s3861_s13] ss:$0 sm:$0xff] }
 0x7cc   :  { %v1047_v7 = vpop.xlane.xlu1 %1046 }
 0x7cd   :  { %v1051_v8 = vmul.f32 0.03125, %v1047_v7 }
 0x7cf   :  { %v1053_v9 = vsub.f32 %v1041_v3, %v1051_v8 }
 0x7d0   :  { %v1050_v10 = vpop.xlane.xlu1 %1049 }
 0x7d1   :  { %v1052_v11 = vmul.f32 0.03125, %v1050_v10  ;;  %v1055_v12 = vmul.f32 %v1053_v9, %v1053_v9 }
 0x7d3   :  { %v1054_v13 = vsub.f32 %v1042_v5, %v1052_v11  ;;  %v1057_v14 = vsel %vm73_vm0, %v1055_v12, 0.0 }
 0x7d4   :  { %1058 = vadd.xlane.f32.xlu0 %v1057_v14 }
 0x7d5   :  { %v1056_v15 = vmul.f32 %v1054_v13, %v1054_v13 }
 0x7d7   :  { %v1060_v38 = vsel %vm73_vm0, %v1056_v15, 0.0 }
 0x7d8   :  { %1061 = vadd.xlane.f32.xlu1 %v1060_v38 }
 0x7ea   :  { %1348 = vperm.xlu0 %3063, %v2709_v39  }
 0x861   :  { %v1059_v18 = vpop.xlane.xlu0 %1058 }
 0x862   :  { %v1063_v19 = vmul.f32 0.03125, %v1059_v18 }
 0x864   :  { %v1065_v20 = vadd.f32 1e-12, %v1063_v19 }
 0x865   :  { %v1062_v21 = vpop.xlane.xlu1 %1061 }
 0x866   :  { %3145 = vrsqrt.f32 %v1065_v20  ;;  %v1064_v22 = vmul.f32 0.03125, %v1062_v21 }
 0x868   :  { %v1066_v23 = vadd.f32 1e-12, %v1064_v22 }
 0x86a   :  { %3147 = vrsqrt.f32 %v1066_v23 }
 0x870   :  { %v3146_v24 = vpop.eup %3145 }
 0x871   :  { %v1069_v25 = vmul.f32 %v3146_v24, %v1053_v9 }
 0x873   :  { %v1077_v29 = vmul.f32 %v2680_v26, %v1069_v25  ;;  %v2706_v25 = vld [vmem:[%s3853_s5 + $0x60] sm:$0xff] }
 0x874   :  { %v3148_v27 = vpop.eup %3147 }
 0x875   :  { %v1070_v31 = vmul.f32 %v3148_v27, %v1054_v13  ;;  %v1085_v34 = vadd.f32 %v2681_v32, %v1077_v29  ;;  %v2708_v27 = vld [vmem:[%s3853_s5 + $0x70] sm:$0xff]  ;;  %v2710_v29 = vld [vmem:[%s3853_s5 + $0x80] sm:$0xff] }
 0x877   :  { %v1078_v33 = vmul.f32 %v2680_v26, %v1070_v31  ;;  %v2707_v26 = vld [vmem:[%s3853_s5 + $0x68] sm:$0xff] }
 0x878   :  { %v2711_v31 = vld [vmem:[%s3853_s5 + $0x88] sm:$0xff] }
 0x879   :  { %v1086_v35 = vadd.f32 %v2681_v32, %v1078_v33  ;;  %v2712_v32 = vld [vmem:[%s3853_s5 + $0x90] sm:$0xff]  ;;  %v2713_v33 = vld [vmem:[%s3853_s5 + $0x98] sm:$0xff] }
 0x87b   :  { %v1092_v36 = vpack.c.bf16 %v1086_v35, %v1085_v34 }
 0x87d   :  { %2936 = vmatmul.mubr.msk.bf16.vlgmr.msra.gmra.mrb[24].mxu1 %vm73_vm0, %v1092_v36 }
 0x950   :  { %v1148_v44 = vpop.f32.mrb[24].mxu1 }
 0x951   :  { %v1149_v46 = vadd.f32 %v2682_v43, %v1148_v44  ;;  %v2937_v47 = vpop.f32.mrb[25].mxu1 }
 0x952   :  { %v1151_v48 = vpop.f32.mrb[26].mxu1 }
 0x953   :  { %v1157_v49 = vmul.f32 0.044715, %v1149_v46  ;;  %v1152_v50 = vadd.f32 %v2682_v43, %v1151_v48  ;;  %v2938_v51 = vpop.f32.mrb[27].mxu1  ;;  %v1155_v0 = vmul.f32 0.5, %v1149_v46 }
 0x955   :  { %v1159_v52 = vmul.f32 %v1157_v49, %v1149_v46  ;;  %v1158_v53 = vmul.f32 0.044715, %v1152_v50  ;;  %v1156_v1 = vmul.f32 0.5, %v1152_v50 }
 0x957   :  { %v1161_v54 = vmul.f32 %v1159_v52, %v1149_v46  ;;  %v1160_v55 = vmul.f32 %v1158_v53, %v1152_v50 }
 0x959   :  { %v1163_v56 = vadd.f32 %v1161_v54, %v1149_v46  ;;  %v1162_v57 = vmul.f32 %v1160_v55, %v1152_v50  ;;  %v2692_v46 = vld [vmem:[%s3862_s14] ss:$0 sm:$0xff] }
 0x95b   :  { %v1165_v58 = vmul.f32 0.7978846, %v1163_v56  ;;  %v1164_v59 = vadd.f32 %v1162_v57, %v1152_v50  ;;  %v2693_v50 = vld [vmem:[%s3863_s15] ss:$0 sm:$0xff]  ;;  %v3092_v56 = vld [vmem:[%s3878_s26 + $0x38] sm:$0xff]  }
 0x95c   :  { %v3093_v57 = vld [vmem:[%s3878_s26 + $0x40] sm:$0xff]  }
 0x95d   :  { %3149 = vtanh.f32 %v1165_v58  ;;  %v1166_v60 = vmul.f32 0.7978846, %v1164_v59  ;;  %v3094_v58 = vld [vmem:[%s3878_s26 + $0x48] sm:$0xff]  }
 0x95f   :  { %3151 = vtanh.f32 %v1166_v60 }
 0x967   :  { %v3150_v61 = vpop.eup %3149 }
 0x968   :  { %v1169_v62 = vadd.f32 1.0, %v3150_v61 }
 0x969   :  { %v3152_v63 = vpop.eup %3151 }
 0x96a   :  { %v1170_v2 = vadd.f32 1.0, %v3152_v63  ;;  %v1171_v3 = vmul.f32 %v1169_v62, %v1155_v0  ;;  %v1349_v0 = vpop.permute.xlu0 %1348 }
 0x96c   :  { %v1172_v4 = vmul.f32 %v1170_v2, %v1156_v1 }
 0x96e   :  { %v1182_v5 = vpack.c.bf16 %v1172_v4, %v1171_v3 }
 0x970   :  { %2948 = vmatmul.mubr.msk.bf16.vlgmr.msra.gmra.mrb[24].mxu0 %vm1213_vm5, %v1182_v5 }
 0x971   :  { %2967 = vmatprep.mubr.msk.bf16.mxu0 %vm3229_vm1, %v3228_v45 }
 0xa43   :  { %v1251_v7 = vpop.f32.mrb[24].mxu0 }
 0xa44   :  { %v1252_v8 = vadd.f32 %v2686_v6, %v1251_v7  ;;  %v2949_v9 = vpop.f32.mrb[25].mxu0 }
 0xa45   :  { %v1254_v10 = vpop.f32.mrb[26].mxu0 }
 0xa46   :  { %v1255_v11 = vadd.f32 %v2686_v6, %v1254_v10  ;;  %v2950_v12 = vpop.f32.mrb[27].mxu0  ;;  %v1258_v13 = vadd.f32 %v1252_v8, %v1085_v34  ;;  %v3091_v34 = vld [vmem:[%s3878_s26 + $0x30] sm:$0xff]  }
 0xa47   :  { %2953 = vmatprep.mubr.msk.bf16.mxu1 %vm73_vm0, %v3091_v34 }
 0xa48   :  { %v1262_v14 = vsel %vm73_vm0, %v1258_v13, 0.0  ;;  %v1259_v15 = vadd.f32 %v1255_v11, %v1086_v35 }
 0xa49   :  { %1263 = vadd.xlane.f32.xlu1 %v1262_v14 }
 0xa4a   :  { %v1265_v38 = vsel %vm73_vm0, %v1259_v15, 0.0 }
 0xa4d   :  { %1266 = vadd.xlane.f32.xlu1 %v1265_v38 }
 0xad6   :  { %v1264_v39 = vpop.xlane.xlu1 %1263 }
 0xad7   :  { %v1268_v16 = vmul.f32 0.03125, %v1264_v39 }
 0xad9   :  { %v1270_v17 = vsub.f32 %v1258_v13, %v1268_v16 }
 0xada   :  { %v1267_v18 = vpop.xlane.xlu1 %1266 }
 0xadb   :  { %v1269_v19 = vmul.f32 0.03125, %v1267_v18  ;;  %v1272_v20 = vmul.f32 %v1270_v17, %v1270_v17  ;;  %v3096_v18 = vld [vmem:[%s3878_s26 + $0x58] sm:$0xff]  }
 0xadd   :  { %v1271_v21 = vsub.f32 %v1259_v15, %v1269_v19  ;;  %v1274_v22 = vsel %vm73_vm0, %v1272_v20, 0.0 }
 0xade   :  { %1275 = vadd.xlane.f32.xlu1 %v1274_v22 }
 0xadf   :  { %v1273_v23 = vmul.f32 %v1271_v21, %v1271_v21 }
 0xae1   :  { %v1277_v24 = vsel %vm73_vm0, %v1273_v23, 0.0 }
 0xae2   :  { %1278 = vadd.xlane.f32.xlu1 %v1277_v24 }
 0xaf3   :  { %1333 = vperm.xlu1 %3064, %v2706_v25  }
 0xaf7   :  { %1338 = vperm.xlu1 %3064, %v2707_v26  }
 0xafb   :  { %1343 = vperm.xlu1 %3064, %v2708_v27  }
 0xaff   :  { %1353 = vperm.xlu1 %3064, %v2710_v29  }
 0xb03   :  { %1358 = vperm.xlu1 %3064, %v2711_v31  }
 0xb07   :  { %1363 = vperm.xlu1 %3064, %v2712_v32  }
 0xb0b   :  { %1368 = vperm.xlu1 %3064, %v2713_v33  }
 0xb6b   :  { %v1276_v35 = vpop.xlane.xlu1 %1275 }
 0xb6c   :  { %v1280_v36 = vmul.f32 0.03125, %v1276_v35 }
 0xb6e   :  { %v1282_v37 = vadd.f32 1e-12, %v1280_v36 }
 0xb6f   :  { %v1279_v40 = vpop.xlane.xlu1 %1278 }
 0xb70   :  { %3153 = vrsqrt.f32 %v1282_v37  ;;  %v1281_v41 = vmul.f32 0.03125, %v1279_v40 }
 0xb72   :  { %v1283_v42 = vadd.f32 1e-12, %v1281_v41 }
 0xb73   :  { %v1334_v59 = vpop.permute.xlu1 %1333 }
 0xb74   :  { %3155 = vrsqrt.f32 %v1283_v42 }
 0xb77   :  { %v1339_v60 = vpop.permute.xlu1 %1338 }
 0xb7a   :  { %v3154_v43 = vpop.eup %3153 }
 0xb7b   :  { %v1286_v44 = vmul.f32 %v3154_v43, %v1270_v17  ;;  %v1344_v61 = vpop.permute.xlu1 %1343  ;;  %v3095_v17 = vld [vmem:[%s3878_s26 + $0x50] sm:$0xff]  }
 0xb7d   :  { %v1294_v49 = vmul.f32 %v2692_v46, %v1286_v44 }
 0xb7e   :  { %v3156_v47 = vpop.eup %3155 }
 0xb7f   :  { %v1287_v48 = vmul.f32 %v3156_v47, %v1271_v21  ;;  %v3619_v52 = vadd.f32 %v2693_v50, %v1294_v49  ;;  %v1354_v62 = vpop.permute.xlu1 %1353 }
 0xb81   :  { %v1295_v51 = vmul.f32 %v2692_v46, %v1287_v48 }
 0xb83   :  { %v3621_v53 = vadd.f32 %v2693_v50, %v1295_v51  ;;  %v1359_v2 = vpop.permute.xlu1 %1358 }
 0xb85   :  { %v1317_v54 = vpack.c.bf16 %v3621_v53, %v3619_v52 }
 0xb87   :  { %3058 = vmatprep.subr.msk.bf16.mxu1 %vm73_vm0, %v1317_v54  ;;  %v1440_v55 = vsel %vm73_vm0, %v1317_v54, 0  ;;  %v1364_v10 = vpop.permute.xlu1 %1363 }
 0xb88   :  { %2952 = vmatpush3.bf16.xpose.msra.mxu1 %v1440_v55 }
 0xb89   :  { %2977 = vmatprep.subr.bf16.mxu1 %v3228_v45 }
 0xb8b   :  { %v1369_v21 = vpop.permute.xlu1 %1368 }
 0xb8f   :  { %2954 = vmatmul.mubr.msk.bf16.vlgmr.msra.gmra.mrb[28].mxu1 %vm73_vm0, %v3092_v56 }
 0xb90   :  { %2957 = vmatprep.mubr.msk.bf16.mxu1 %vm73_vm0, %v3093_v57 }
 0xb97   :  { %2958 = vmatmul.mubr.msk.bf16.gmra.mrb[32].mxu1 %vm73_vm0, %v3094_v58 }
 0xb98   :  { %2961 = vmatprep.mubr.msk.bf16.mxu1 %vm73_vm0, %v3095_v17 }
 0xb9f   :  { %2962 = vmatmul.mubr.msk.bf16.gmra.mrb[36].mxu1 %vm73_vm0, %v3096_v18 }
 0xba0   :  { %2979 = vmatprep.mubr.msk.bf16.mxu1 %vm3229_vm1, %v3228_v45 }
 0xc62   :  { %v2955_v63 = vpop.f32.mrb[28].mxu1 }
 0xc63   :  { %v1476_v1 = vpop.f32.mrb[29].mxu1  ;;  %v1485_v5 = vadd.f32 %v2955_v63, %v1344_v61 }
 0xc64   :  { %v1477_v3 = vadd.f32 %v1476_v1, %v1334_v59  ;;  %v2956_v4 = vpop.f32.mrb[30].mxu1 }
 0xc65   :  { %v1488_v6 = vadd.f32 %v2956_v4, %v1349_v0  ;;  %v1479_v7 = vpop.f32.mrb[31].mxu1 }
 0xc66   :  { %v1480_v8 = vadd.f32 %v1479_v7, %v1339_v60  ;;  %1523 = vxpose.xlu1.b32.start.end [1/1] (short) (narrow) %v1477_v3, 16 }
 0xc67   :  { %v3065_v9 = vpack.i.bf16 %v1488_v6, %v1485_v5 }
 0xc68   :  { %1555 = vxpose.xlu0.b32.start.end [1/1] (short) (narrow) %v1480_v8, 16 }
 0xc6a   :  { %v2959_v11 = vpop.f32.mrb[32].mxu1 }
 0xc6b   :  { %v1501_v12 = vadd.f32 %v2959_v11, %v1364_v10  ;;  %v1492_v13 = vpop.f32.mrb[33].mxu1 }
 0xc6c   :  { %v1493_v14 = vadd.f32 %v1492_v13, %v1354_v62  ;;  %v2960_v15 = vpop.f32.mrb[34].mxu1 }
 0xc6d   :  { %v1657_v38 = vpack.c.bf16 %v1501_v12, %v1501_v12  ;;  %v1495_v39 = vpop.f32.mrb[35].mxu1  ;;  %3066 = vxpose.xlu0.b32.start.end [1/1] (short) (narrow) %v3065_v9, 16  ;;  %v1504_v29 = vadd.f32 %v2960_v15, %v1369_v21 }
 0xc6e   :  { %v1655_v16 = vpack.c.bf16 %v1493_v14, %v1493_v14  ;;  %v1496_v22 = vadd.f32 %v1495_v39, %v1359_v2 }
 0xc6f   :  { %v1757_v19 = vsel %vm474_vm2, %v1657_v38, 0  ;;  %v1658_v33 = vpack.c.bf16 %v1504_v29, %v1504_v29 }
 0xc70   :  { %v1663_v20 = vsel %vm474_vm2, %v1655_v16, 0  ;;  %2978 = vmatpush3.bf16.msra.mxu1 %v1757_v19  ;;  %v1656_v25 = vpack.c.bf16 %v1496_v22, %v1496_v22  ;;  %v2715_v19 = vld [vmem:[%s3853_s5 + $0xa8] sm:$0xff] }
 0xc71   :  { %2966 = vmatpush3.bf16.msra.mxu0 %v1663_v20  ;;  %2989 = vmatprep.subr.bf16.mxu1 %v3228_v45  ;;  %v1804_v36 = vsel %vm474_vm2, %v1658_v33, 0 }
 0xc72   :  { %2971 = vmatprep.subr.bf16.mxu0 %v3228_v45  ;;  %v1710_v32 = vsel %vm474_vm2, %v1656_v25, 0  ;;  %v3670_v47 = vpop.f32.mrb[36].mxu1 }
 0xc73   :  { %v3672_v48 = vpop.f32.mrb[37].mxu1 }
 0xc74   :  { %v3674_v49 = vpop.f32.mrb[38].mxu1 }
 0xc75   :  { %v3676_v50 = vpop.f32.mrb[39].mxu1 }
 0xce6   :  { %v1539_v23 = vpop.trf.xlu1 }
 0xce8   :  { %v1571_v24 = vpop.trf.xlu0 }
 0xcea   :  { %v1540_v26 = vpop.trf.xlu1 }
 0xceb   :  { %v1651_v27 = vpack.c.bf16 %v1540_v26, %v1539_v23 }
 0xcec   :  { %v1572_v31 = vpop.trf.xlu0 }
 0xced   :  { %2968 = vmatmul.mubr.msk.bf16.vlgmr.msra.gmra.mrb[28].mxu0 %vm470_vm3, %v1651_v27  ;;  %v1652_v35 = vpack.c.bf16 %v1572_v31, %v1571_v24 }
 0xcee   :  { %2972 = vmatpush3.bf16.msra.mxu0 %v1710_v32  ;;  %2973 = vmatprep.mubr.msk.bf16.mxu0 %vm3229_vm1, %v3228_v45 }
 0xcef   :  { %2983 = vmatprep.subr.bf16.mxu0 %v3228_v45 }
 0xcf0   :  { %v3067_v34 = vpop.trf.xlu0 }
 0xcf1   :  { %v3068_v40 = vunpack.i.l.bf16 %v3067_v34  ;;  %v3071_v44 = vunpack.i.h.bf16 %v3067_v34 }
 0xcf4   :  { %v3072_v37 = vpop.trf.xlu0 }
 0xcf5   :  { %v3073_v41 = vunpack.i.l.bf16 %v3072_v37  ;;  %2974 = vmatmul.mubr.msk.bf16.vlgmr.msra.gmra.mrb[32].mxu0 %vm470_vm3, %v1652_v35  ;;  %v3076_v42 = vunpack.i.h.bf16 %v3072_v37 }
 0xcf6   :  { %2984 = vmatpush3.bf16.msra.mxu0 %v1804_v36  ;;  %2985 = vmatprep.mubr.msk.bf16.mxu0 %vm3229_vm1, %v3228_v45 }
 0xcf7   :  { %v1653_v43 = vpack.c.bf16 %v3073_v41, %v3068_v40  ;;  %2995 = vmatprep.subr.bf16.mxu0 %v3228_v45  ;;  %v1654_v46 = vpack.c.bf16 %v3076_v42, %v3071_v44 }
 0xcf9   :  { %2980 = vmatmul.mubr.msk.bf16.vlgmr.msra.gmra.mrb[40].mxu1 %vm470_vm3, %v1653_v43 }
 0xcfa   :  { %2991 = vmatprep.mubr.msk.bf16.mxu1 %vm3229_vm1, %v3228_v45 }
 0xcfd   :  { %2986 = vmatmul.mubr.msk.bf16.vlgmr.msra.gmra.mrb[36].mxu0 %vm470_vm3, %v1654_v46 }
 0xcfe   :  { %2997 = vmatprep.mubr.msk.bf16.mxu0 %vm3229_vm1, %v3228_v45 }
 0xdc0   :  { %v1699_v51 = vpop.f32.mrb[28].mxu0 }
 0xdc1   :  { %v1700_v54 = vadd.f32 %v1699_v51, %v3437_v28  ;;  %v2969_v55 = vpop.f32.mrb[29].mxu0 }
 0xdc2   :  { %v1702_v56 = vpop.f32.mrb[30].mxu0 }
 0xdc3   :  { %v1703_v57 = vadd.f32 %v1702_v56, %v3442_v30  ;;  %v2970_v58 = vpop.f32.mrb[31].mxu0  ;;  %v1847_v59 = vsel %vm660_vm4, %v1700_v54, -inf }
 0xdc4   :  { %1848 = vmax.xlane.f32.xlu0 %v1847_v59 }
 0xdc5   :  { %v1850_v60 = vsel %vm660_vm4, %v1703_v57, -inf }
 0xdc6   :  { %1851 = vmax.xlane.f32.xlu1 %v1850_v60 }
 0xdc8   :  { %v1746_v61 = vpop.f32.mrb[32].mxu0 }
 0xdc9   :  { %v1747_v62 = vadd.f32 %v1746_v61, %v3437_v28  ;;  %v2975_v63 = vpop.f32.mrb[33].mxu0 }
 0xdca   :  { %v1749_v0 = vpop.f32.mrb[34].mxu0 }
 0xdcb   :  { %v1750_v1 = vadd.f32 %v1749_v0, %v3442_v30  ;;  %v2976_v2 = vpop.f32.mrb[35].mxu0  ;;  %v1853_v3 = vsel %vm660_vm4, %v1747_v62, -inf }
 0xdcc   :  { %v1793_v4 = vpop.f32.mrb[40].mxu1  ;;  %1854 = vmax.xlane.f32.xlu1 %v1853_v3 }
 0xdcd   :  { %v1794_v5 = vadd.f32 %v1793_v4, %v3437_v28  ;;  %v2981_v6 = vpop.f32.mrb[41].mxu1  ;;  %v1856_v11 = vsel %vm660_vm4, %v1750_v1, -inf }
 0xdce   :  { %v1796_v7 = vpop.f32.mrb[42].mxu1  ;;  %v2716_v6 = vld [vmem:[%s3853_s5 + $0xb0] sm:$0xff] }
 0xdcf   :  { %v1797_v8 = vadd.f32 %v1796_v7, %v3442_v30  ;;  %v2982_v9 = vpop.f32.mrb[43].mxu1  ;;  %v1859_v10 = vsel %vm660_vm4, %v1794_v5, -inf  ;;  %v2717_v7 = vld [vmem:[%s3853_s5 + $0xb8] sm:$0xff] }
 0xdd0   :  { %1860 = vmax.xlane.f32.xlu0 %v1859_v10  ;;  %1857 = vmax.xlane.f32.xlu1 %v1856_v11  ;;  %v1840_v12 = vpop.f32.mrb[36].mxu0 }
 0xdd1   :  { %v1841_v13 = vadd.f32 %v1840_v12, %v3437_v28  ;;  %v2987_v14 = vpop.f32.mrb[37].mxu0  ;;  %v1862_v16 = vsel %vm660_vm4, %v1797_v8, -inf  ;;  %v2714_v28 = vld [vmem:[%s3853_s5 + $0xa0] sm:$0xff] }
 0xdd2   :  { %v1843_v15 = vpop.f32.mrb[38].mxu0 }
 0xdd3   :  { %v1844_v38 = vadd.f32 %v1843_v15, %v3442_v30  ;;  %v2988_v39 = vpop.f32.mrb[39].mxu0  ;;  %v1865_v17 = vsel %vm660_vm4, %v1841_v13, -inf }
 0xdd4   :  { %1863 = vmax.xlane.f32.xlu1 %v1862_v16  ;;  %1866 = vmax.xlane.f32.xlu0 %v1865_v17 }
 0xdd5   :  { %v1868_v18 = vsel %vm660_vm4, %v1844_v38, -inf }
 0xdd8   :  { %1869 = vmax.xlane.f32.xlu1 %v1868_v18 }
 0xde9   :  { %1378 = vperm.xlu1 %3064, %v2715_v19  }
 0xdea   :  { %1373 = vperm.xlu0 %3063, %v2714_v28  }
 0xe51   :  { %v1849_v20 = vpop.xlane.xlu0 %1848 }
 0xe52   :  { %v1871_v22 = vsub.f32 %v1700_v54, %v1849_v20 }
 0xe53   :  { %v1852_v30 = vpop.xlane.xlu1 %1851 }
 0xe54   :  { %v1872_v26 = vsub.f32 %v1703_v57, %v1852_v30  ;;  %v1879_v27 = vmul.f32 1.442695, %v1871_v22 }
 0xe56   :  { %v1881_v35 = vmul.f32 1.442695, %v1872_v26 }
 0xe59   :  { %v1855_v21 = vpop.xlane.xlu1 %1854 }
 0xe5a   :  { %v1873_v29 = vsub.f32 %v1747_v62, %v1855_v21 }
 0xe5c   :  { %v1883_v37 = vmul.f32 1.442695, %v1873_v29 }
 0xe5d   :  { %v1861_v23 = vpop.xlane.xlu0 %1860  ;;  %v1858_v24 = vpop.xlane.xlu1 %1857 }
 0xe5e   :  { %v1875_v25 = vsub.f32 %v1794_v5, %v1861_v23  ;;  %v1874_v36 = vsub.f32 %v1750_v1, %v1858_v24 }
 0xe60   :  { %v1887_v31 = vmul.f32 1.442695, %v1875_v25  ;;  %v1885_v43 = vmul.f32 1.442695, %v1874_v36 }
 0xe61   :  { %v1864_v32 = vpop.xlane.xlu1 %1863  ;;  %v1867_v33 = vpop.xlane.xlu0 %1866 }
 0xe62   :  { %3157 = vpow2.f32 %v1887_v31  ;;  %v1876_v34 = vsub.f32 %v1797_v8, %v1864_v32  ;;  %v1877_v41 = vsub.f32 %v1841_v13, %v1867_v33 }
 0xe63   :  { %3159 = vpow2.f32 %v1879_v27 }
 0xe64   :  { %v1889_v40 = vmul.f32 1.442695, %v1876_v34  ;;  %v1891_v44 = vmul.f32 1.442695, %v1877_v41 }
 0xe65   :  { %v1870_v42 = vpop.xlane.xlu1 %1869 }
 0xe66   :  { %3161 = vpow2.f32 %v1889_v40  ;;  %v1878_v46 = vsub.f32 %v1844_v38, %v1870_v42 }
 0xe67   :  { %3163 = vpow2.f32 %v1881_v35 }
 0xe68   :  { %3165 = vpow2.f32 %v1883_v37  ;;  %v1893_v54 = vmul.f32 1.442695, %v1878_v46 }
 0xe69   :  { %3167 = vpow2.f32 %v1885_v43  ;;  %v1374_v8 = vpop.permute.xlu0 %1373  ;;  %v1379_v9 = vpop.permute.xlu1 %1378 }
 0xe6a   :  { %3169 = vpow2.f32 %v1891_v44  ;;  %v1509_v29 = vadd.f32 %v3672_v48, %v1374_v8  ;;  %v1512_v40 = vadd.f32 %v3676_v50, %v1379_v9 }
 0xe6b   :  { %3171 = vpow2.f32 %v1893_v54 }
 0xe6c   :  { %v3700_v51 = vpop.eup %3157  ;;  %v1935_v37 = vpack.c.bf16 %v1509_v29, %v1509_v29  ;;  %v1936_v44 = vpack.c.bf16 %v1512_v40, %v1512_v40  ;;  %v3100_v29 = vld [vmem:[%s3858_s10 + $0x18] sm:$0xff]  }
 0xe6d   :  { %v1907_v55 = vsel %vm660_vm4, %v3700_v51, 0.0  ;;  %v3160_v56 = vpop.eup %3159 }
 0xe6e   :  { %1908 = vadd.xlane.f32.xlu0 %v1907_v55  ;;  %v1895_v59 = vsel %vm660_vm4, %v3160_v56, 0.0 }
 0xe70   :  { %v3162_v57 = vpop.eup %3161 }
 0xe71   :  { %v3164_v58 = vpop.eup %3163  ;;  %v1910_v60 = vsel %vm660_vm4, %v3162_v57, 0.0 }
 0xe72   :  { %v3166_v61 = vpop.eup %3165  ;;  %1896 = vadd.xlane.f32.xlu0 %v1895_v59  ;;  %1911 = vadd.xlane.f32.xlu1 %v1910_v60  ;;  %v1898_v0 = vsel %vm660_vm4, %v3164_v58, 0.0 }
 0xe73   :  { %v3168_v62 = vpop.eup %3167  ;;  %v1901_v63 = vsel %vm660_vm4, %v3166_v61, 0.0 }
 0xe74   :  { %v3170_v1 = vpop.eup %3169  ;;  %v1904_v3 = vsel %vm660_vm4, %v3168_v62, 0.0 }
 0xe75   :  { %v1913_v2 = vsel %vm660_vm4, %v3170_v1, 0.0  ;;  %v3172_v4 = vpop.eup %3171 }
 0xe76   :  { %1902 = vadd.xlane.f32.xlu0 %v1901_v63  ;;  %1899 = vadd.xlane.f32.xlu1 %v1898_v0  ;;  %v1916_v5 = vsel %vm660_vm4, %v3172_v4, 0.0 }
 0xe7a   :  { %1914 = vadd.xlane.f32.xlu0 %v1913_v2  ;;  %1905 = vadd.xlane.f32.xlu1 %v1904_v3 }
 0xe7e   :  { %1917 = vadd.xlane.f32.xlu1 %v1916_v5 }
 0xe8f   :  { %1383 = vperm.xlu1 %3064, %v2716_v6  }
 0xe90   :  { %1388 = vperm.xlu0 %3063, %v2717_v7  }
 0xefb   :  { %v1909_v10 = vpop.xlane.xlu0 %1908 }
 0xeff   :  { %v1897_v11 = vpop.xlane.xlu0 %1896  ;;  %v1912_v12 = vpop.xlane.xlu1 %1911 }
 0xf00   :  { %3173 = vrcp.f32 %v1897_v11 }
 0xf03   :  { %v1900_v13 = vpop.xlane.xlu1 %1899  ;;  %v1903_v14 = vpop.xlane.xlu0 %1902 }
 0xf04   :  { %3175 = vrcp.f32 %v1900_v13 }
 0xf05   :  { %3177 = vrcp.f32 %v1912_v12  ;;  %v2743_v12 = vld [vmem:[%s3855_s7 + $0x1] ss:$0 sm:$0xff] }
 0xf06   :  { %3179 = vrcp.f32 %v1903_v14 }
 0xf07   :  { %v1906_v15 = vpop.xlane.xlu1 %1905  ;;  %3181 = vrcp.f32 %v1909_v10  ;;  %v1915_v38 = vpop.xlane.xlu0 %1914 }
 0xf08   :  { %3183 = vrcp.f32 %v1906_v15 }
 0xf0a   :  { %v3174_v16 = vpop.eup %3173 }
 0xf0b   :  { %v1918_v39 = vpop.xlane.xlu1 %1917  ;;  %v1927_v19 = vmul.f32 %v3174_v16, %v3160_v56  ;;  %v3097_v56 = vld [vmem:[%s3854_s6 + $0x10] sm:$0xff]  }
 0xf0c   :  { %3185 = vrcp.f32 %v1918_v39 }
 0xf0d   :  { %3187 = vrcp.f32 %v1915_v38 }
 0xf0e   :  { %v3176_v17 = vpop.eup %3175 }
 0xf0f   :  { %v3178_v18 = vpop.eup %3177  ;;  %v1928_v28 = vmul.f32 %v3176_v17, %v3164_v58  ;;  %v1384_v42 = vpop.permute.xlu1 %1383  ;;  %v3098_v58 = vld [vmem:[%s3854_s6 + $0x18] sm:$0xff]  }
 0xf10   :  { %v3180_v30 = vpop.eup %3179  ;;  %v1932_v26 = vmul.f32 %v3178_v18, %v3162_v57  ;;  %v1517_v46 = vadd.f32 %v3670_v47, %v1384_v42 }
 0xf11   :  { %v3182_v20 = vpop.eup %3181  ;;  %v1939_v21 = vpack.c.bf16 %v1928_v28, %v1927_v19  ;;  %v1929_v24 = vmul.f32 %v3180_v30, %v3166_v61 }
 0xf12   :  { %v3184_v22 = vpop.eup %3183  ;;  %v1931_v32 = vmul.f32 %v3182_v20, %v3700_v51  ;;  %v1389_v51 = vpop.permute.xlu0 %1388  ;;  %v1937_v55 = vpack.c.bf16 %v1517_v46, %v1517_v46 }
 0xf13   :  { %v1947_v23 = vsel %vm660_vm4, %v1939_v21, 0  ;;  %v1930_v25 = vmul.f32 %v3184_v22, %v3168_v62  ;;  %v1520_v54 = vadd.f32 %v3674_v49, %v1389_v51 }
 0xf14   :  { %2990 = vmatpush3.bf16.xpose.msra.mxu1 %v1947_v23  ;;  %v1941_v35 = vpack.c.bf16 %v1932_v26, %v1931_v32 }
 0xf15   :  { %v1940_v31 = vpack.c.bf16 %v1930_v25, %v1929_v24  ;;  %3001 = vmatprep.subr.bf16.mxu1 %v3228_v45  ;;  %v1938_v47 = vpack.c.bf16 %v1520_v54, %v1520_v54 }
 0xf16   :  { %v3186_v27 = vpop.eup %3185  ;;  %v2039_v48 = vsel %vm660_vm4, %v1941_v35, 0 }
 0xf17   :  { %v3188_v33 = vpop.eup %3187  ;;  %v1993_v34 = vsel %vm660_vm4, %v1940_v31, 0  ;;  %v1934_v36 = vmul.f32 %v3186_v27, %v3172_v4 }
 0xf18   :  { %2996 = vmatpush3.bf16.xpose.msra.mxu0 %v1993_v34  ;;  %v1933_v41 = vmul.f32 %v3188_v33, %v3170_v1 }
 0xf19   :  { %3007 = vmatprep.subr.bf16.mxu0 %v3228_v45 }
 0xf1a   :  { %v1942_v43 = vpack.c.bf16 %v1934_v36, %v1933_v41  ;;  %v2749_v41 = vld [vmem:[%s3856_s8 + $0x1] ss:$0 sm:$0xff] }
 0xf1b   :  { %2992 = vmatmul.mubr.msk.bf16.vlgmr.msra.gmra.mrb[44].mxu1 %vm660_vm4, %v1935_v37 }
 0xf1c   :  { %3002 = vmatpush3.bf16.xpose.msra.mxu1 %v2039_v48  ;;  %3003 = vmatprep.mubr.msk.bf16.mxu1 %vm3229_vm1, %v3228_v45  ;;  %v2085_v50 = vsel %vm660_vm4, %v1942_v43, 0 }
 0xf1d   :  { %3013 = vmatprep.subr.bf16.mxu1 %v3228_v45 }
 0xf1f   :  { %2998 = vmatmul.mubr.msk.bf16.vlgmr.msra.gmra.mrb[40].mxu0 %vm660_vm4, %v1936_v44  ;;  %v2750_v44 = vld [vmem:[%s3857_s9 + $0x1] ss:$0 sm:$0xff] }
 0xf20   :  { %3008 = vmatpush3.bf16.xpose.msra.mxu0 %v2085_v50  ;;  %3009 = vmatprep.mubr.msk.bf16.mxu0 %vm3229_vm1, %v3228_v45 }
 0xf21   :  { %3021 = vmatprep.subr.bf16.mxu0 %v3228_v45 }
 0xf23   :  { %3004 = vmatmul.mubr.msk.bf16.vlgmr.msra.gmra.mrb[48].mxu1 %vm660_vm4, %v1937_v55  ;;  %v3101_v55 = vld [vmem:[%s3860_s12 + $0x20] sm:$0xff]  }
 0xf24   :  { %3017 = vmatprep.mubr.msk.bf16.mxu1 %vm3229_vm1, %v3228_v45  ;;  %3014 = vmatpush3.bf16.msra.mxu1 %v3097_v56  ;;  %v3103_v56 = vld [vmem:[%s3860_s12 + $0x30] sm:$0xff]  }
 0xf25   :  { %3015 = vmatprep.subr.bf16.mxu1 %v3228_v45 }
 0xf27   :  { %3010 = vmatmul.mubr.msk.bf16.vlgmr.msra.gmra.mrb[44].mxu0 %vm660_vm4, %v1938_v47  ;;  %v3102_v47 = vld [vmem:[%s3860_s12 + $0x28] sm:$0xff]  }
 0xf28   :  { %3025 = vmatprep.mubr.msk.bf16.mxu0 %vm3229_vm1, %v3228_v45  ;;  %3016 = vmatpush3.bf16.msra.mxu1 %v3098_v58 }
 0xf29   :  { %3029 = vmatprep.subr.bf16.mxu1 %v3228_v45 }
 0xfee   :  { %v1983_v49 = vpop.f32.mrb[44].mxu1 }
 0xfef   :  { %2127 = vxpose.xlu1.b32.start [1/4] (short) (narrow) %v1983_v49, 16  ;;  %v2993_v57 = vpop.f32.mrb[45].mxu1  ;;  %v3104_v49 = vld [vmem:[%s3860_s12 + $0x38] sm:$0xff]  }
 0xff0   :  { %v1986_v59 = vpop.f32.mrb[46].mxu1  ;;  %v2756_v57 = vld [vmem:[%s3859_s11 + $0x1] ss:$0 sm:$0xff] }
 0xff1   :  { %v2994_v60 = vpop.f32.mrb[47].mxu1 }
 0xff2   :  { %v2029_v61 = vpop.f32.mrb[40].mxu0 }
 0xff3   :  { %2128 = vxpose.xlu1.b32.cont [2/4] (short) (narrow) %v2029_v61, 16  ;;  %v2999_v62 = vpop.f32.mrb[41].mxu0 }
 0xff4   :  { %v2032_v63 = vpop.f32.mrb[42].mxu0 }
 0xff5   :  { %v3000_v0 = vpop.f32.mrb[43].mxu0 }
 0xff6   :  { %v2075_v1 = vpop.f32.mrb[48].mxu1 }
 0xff7   :  { %v3005_v2 = vpop.f32.mrb[49].mxu1  ;;  %2129 = vxpose.xlu1.b32.cont [3/4] (short) (narrow) %v2075_v1, 16 }
 0xff8   :  { %v2078_v3 = vpop.f32.mrb[50].mxu1 }
 0xff9   :  { %v3006_v4 = vpop.f32.mrb[51].mxu1 }
 0xffa   :  { %v2121_v5 = vpop.f32.mrb[44].mxu0 }
 0xffb   :  { %2130 = vxpose.xlu1.b32.end [4/4] (short) (narrow) %v2121_v5, 16  ;;  %v3011_v6 = vpop.f32.mrb[45].mxu0 }
 0xffc   :  { %v2124_v7 = vpop.f32.mrb[46].mxu0 }
 0xffd   :  { %v3012_v8 = vpop.f32.mrb[47].mxu0 }
0x106f   :  { %v2143_v9 = vpop.trf.xlu1 }
0x1073   :  { %v2144_v10 = vpop.trf.xlu1 }
0x1074   :  { %v2166_v11 = vpack.c.bf16 %v2144_v10, %v2143_v9 }
0x1076   :  { %3018 = vmatmul.mubr.msk.bf16.vlgmr.msra.gmra.mrb[52].mxu1 %vm73_vm0, %v2166_v11 }
0x1077   :  { %3037 = vmatprep.mubr.msk.bf16.mxu1 %vm3229_vm1, %v3228_v45  ;;  %3030 = vmatpush3.bf16.msra.mxu1 %v3101_v55 }
0x1078   :  { %3031 = vmatprep.subr.bf16.mxu1 %v3228_v45 }
0x107b   :  { %3032 = vmatpush3.bf16.msra.mxu1 %v3102_v47 }
0x107c   :  { %3033 = vmatprep.subr.bf16.mxu1 %v3228_v45 }
0x107f   :  { %3034 = vmatpush3.bf16.msra.mxu1 %v3103_v56 }
0x1080   :  { %3035 = vmatprep.subr.bf16.mxu1 %v3228_v45 }
0x1083   :  { %3036 = vmatpush3.bf16.msra.mxu1 %v3104_v49 }
0x1149   :  { %v2222_v13 = vpop.f32.mrb[52].mxu1 }
0x114a   :  { %v2223_v14 = vadd.f32 %v2743_v12, %v2222_v13  ;;  %v3019_v15 = vpop.f32.mrb[53].mxu1 }
0x114b   :  { %v2225_v38 = vpop.f32.mrb[54].mxu1 }
0x114c   :  { %v2226_v39 = vadd.f32 %v2743_v12, %v2225_v38  ;;  %v3020_v16 = vpop.f32.mrb[55].mxu1  ;;  %v2229_v17 = vadd.f32 %v2223_v14, %v3619_v52 }
0x114e   :  { %v2235_v18 = vsel %vm73_vm0, %v2229_v17, 0.0  ;;  %v2230_v19 = vadd.f32 %v2226_v39, %v3621_v53  ;;  %v3099_v53 = vld [vmem:[%s3858_s10 + $0x10] sm:$0xff]  }
0x114f   :  { %2236 = vadd.xlane.f32.xlu0 %v2235_v18  ;;  %3022 = vmatpush3.bf16.msra.mxu0 %v3099_v53 }
0x1150   :  { %v2238_v28 = vsel %vm73_vm0, %v2230_v19, 0.0  ;;  %3023 = vmatprep.subr.bf16.mxu0 %v3228_v45 }
0x1153   :  { %2239 = vadd.xlane.f32.xlu0 %v2238_v28  ;;  %3024 = vmatpush3.bf16.msra.mxu0 %v3100_v29 }
0x1154   :  { %3041 = vmatprep.subr.bf16.mxu0 %v3228_v45 }
0x11dc   :  { %v2237_v30 = vpop.xlane.xlu0 %2236 }
0x11dd   :  { %v2241_v20 = vmul.f32 0.03125, %v2237_v30 }
0x11df   :  { %v2243_v21 = vsub.f32 %v2229_v17, %v2241_v20  ;;  %v2769_v17 = vld [vmem:[%s3861_s13 + $0x1] ss:$0 sm:$0xff] }
0x11e0   :  { %v2240_v22 = vpop.xlane.xlu0 %2239 }
0x11e1   :  { %v2242_v23 = vmul.f32 0.03125, %v2240_v22  ;;  %v2245_v24 = vmul.f32 %v2243_v21, %v2243_v21 }
0x11e3   :  { %v2244_v25 = vsub.f32 %v2230_v19, %v2242_v23  ;;  %v2247_v26 = vsel %vm73_vm0, %v2245_v24, 0.0 }
0x11e4   :  { %2248 = vadd.xlane.f32.xlu0 %v2247_v26 }
0x11e5   :  { %v2246_v27 = vmul.f32 %v2244_v25, %v2244_v25 }
0x11e7   :  { %v2250_v52 = vsel %vm73_vm0, %v2246_v27, 0.0 }
0x11e8   :  { %2251 = vadd.xlane.f32.xlu0 %v2250_v52 }
0x1271   :  { %v2249_v31 = vpop.xlane.xlu0 %2248 }
0x1272   :  { %v2253_v32 = vmul.f32 0.03125, %v2249_v31 }
0x1274   :  { %v2255_v33 = vadd.f32 1e-12, %v2253_v32 }
0x1275   :  { %v2252_v34 = vpop.xlane.xlu0 %2251 }
0x1276   :  { %3189 = vrsqrt.f32 %v2255_v33  ;;  %v2254_v35 = vmul.f32 0.03125, %v2252_v34 }
0x1278   :  { %v2256_v36 = vadd.f32 1e-12, %v2254_v35 }
0x127a   :  { %3191 = vrsqrt.f32 %v2256_v36  ;;  %v3105_v36 = vld [vmem:[%s3864_s16] sm:$0xff]  }
0x1280   :  { %v3190_v37 = vpop.eup %3189 }
0x1281   :  { %v2259_v40 = vmul.f32 %v3190_v37, %v2243_v21  ;;  %v3106_v37 = vld [vmem:[%s3864_s16 + $0x8] sm:$0xff]  }
0x1283   :  { %v2267_v48 = vmul.f32 %v2749_v41, %v2259_v40 }
0x1284   :  { %v3192_v42 = vpop.eup %3191 }
0x1285   :  { %v2260_v43 = vmul.f32 %v3192_v42, %v2244_v25  ;;  %v2275_v51 = vadd.f32 %v2750_v44, %v2267_v48 }
0x1287   :  { %v2268_v46 = vmul.f32 %v2749_v41, %v2260_v43 }
0x1289   :  { %v2276_v50 = vadd.f32 %v2750_v44, %v2268_v46 }
0x128b   :  { %v2284_v54 = vpack.c.bf16 %v2276_v50, %v2275_v51 }
0x128d   :  { %3026 = vmatmul.mubr.msk.bf16.vlgmr.msra.gmra.mrb[48].mxu0 %vm73_vm0, %v2284_v54  ;;  %v2778_v54 = vld [vmem:[%s3863_s15 + $0x1] ss:$0 sm:$0xff] }
0x128e   :  { %3045 = vmatprep.mubr.msk.bf16.mxu0 %vm3229_vm1, %v3228_v45  ;;  %3042 = vmatpush3.bf16.msra.mxu0 %v3105_v36 }
0x128f   :  { %3043 = vmatprep.subr.bf16.mxu0 %v3228_v45 }
0x1292   :  { %3044 = vmatpush3.bf16.msra.mxu0 %v3106_v37 }
0x1293   :  { %3049 = vmatprep.subr.bf16.mxu0 %v3228_v45 }
0x1360   :  { %v2340_v58 = vpop.f32.mrb[48].mxu0 }
0x1361   :  { %v2341_v59 = vadd.f32 %v2756_v57, %v2340_v58  ;;  %v3027_v60 = vpop.f32.mrb[49].mxu0 }
0x1362   :  { %v2343_v61 = vpop.f32.mrb[50].mxu0 }
0x1363   :  { %v2349_v62 = vmul.f32 0.044715, %v2341_v59  ;;  %v2344_v63 = vadd.f32 %v2756_v57, %v2343_v61  ;;  %v3028_v0 = vpop.f32.mrb[51].mxu0  ;;  %v2347_v13 = vmul.f32 0.5, %v2341_v59 }
0x1364   :  { %v2779_v0 = vld [vmem:[%s3865_s17] ss:$0 sm:$0xff] }
0x1365   :  { %v2351_v1 = vmul.f32 %v2349_v62, %v2341_v59  ;;  %v2350_v2 = vmul.f32 0.044715, %v2344_v63  ;;  %v2348_v14 = vmul.f32 0.5, %v2344_v63  ;;  %v3107_v62 = vld [vmem:[%s3866_s18] sm:$0xff]  }
0x1367   :  { %v2353_v3 = vmul.f32 %v2351_v1, %v2341_v59  ;;  %v2352_v4 = vmul.f32 %v2350_v2, %v2344_v63 }
0x1369   :  { %v2355_v5 = vadd.f32 %v2353_v3, %v2341_v59  ;;  %v2354_v6 = vmul.f32 %v2352_v4, %v2344_v63 }
0x136b   :  { %v2357_v7 = vmul.f32 0.7978846, %v2355_v5  ;;  %v2356_v8 = vadd.f32 %v2354_v6, %v2344_v63  ;;  %v3108_v63 = vld [vmem:[%s3866_s18 + $0x8] sm:$0xff]   ;;  %s3230_s18 = smov [#allocation2]  }
0x136c   :  { %s2646_s22 = sshll.u32 %s3230_s18, 4  ;;  %s2647_s22 = int_to_ptr.vmem [resolvable:$true] %s2646_s22 }
0x136d   :  { %3193 = vtanh.f32 %v2357_v7  ;;  %v2358_v9 = vmul.f32 0.7978846, %v2356_v8  ;;  %s3203_s17 = scalar_lea.vmem %s2647_s22, 32  ;;  %p3208_p1 = scmp.lt.s32.totalorder %s2647_s22, %s2647_s22 }
0x136e   :  { %p3204_p0 = scmp.ne.s32.totalorder %s2647_s22, %s3203_s17  ;;  %p3209_p2 = scmp.lt.s32.totalorder %s3203_s17, %s3203_s17 }
0x136f   :  { %3195 = vtanh.f32 %v2358_v9 }
0x1370   :  { %p3210_p3 = por %p3209_p2, %p3208_p1 }
0x1372   :  { %p3211_p4 = pnand %p3210_p3, %p3204_p0 }
0x1377   :  { %v3194_v10 = vpop.eup %3193 }
0x1378   :  { %v2361_v11 = vadd.f32 1.0, %v3194_v10 }
0x1379   :  { %v3196_v12 = vpop.eup %3195 }
0x137a   :  { %v2362_v15 = vadd.f32 1.0, %v3196_v12  ;;  %v2363_v38 = vmul.f32 %v2361_v11, %v2347_v13 }
0x137c   :  { %v2364_v39 = vmul.f32 %v2362_v15, %v2348_v14 }
0x137e   :  { %v2376_v16 = vpack.c.bf16 %v2364_v39, %v2363_v38 }
0x1380   :  { %3038 = vmatmul.mubr.msk.bf16.vlgmr.msra.gmra.mrb[56].mxu1 %vm1213_vm5, %v2376_v16 }
0x1453   :  { %v2444_v18 = vpop.f32.mrb[56].mxu1 }
0x1454   :  { %v3039_v19 = vpop.f32.mrb[57].mxu1  ;;  %v2445_v30 = vadd.f32 %v2769_v17, %v2444_v18 }
0x1455   :  { %v2447_v28 = vpop.f32.mrb[58].mxu1 }
0x1456   :  { %v2448_v20 = vadd.f32 %v2769_v17, %v2447_v28  ;;  %v3040_v21 = vpop.f32.mrb[59].mxu1  ;;  %v2451_v24 = vadd.f32 %v2445_v30, %v2275_v51  ;;  %v2777_v51 = vld [vmem:[%s3862_s14 + $0x1] ss:$0 sm:$0xff] }
0x1458   :  { %v2452_v22 = vadd.f32 %v2448_v20, %v2276_v50  ;;  %v2457_v25 = vsel %vm73_vm0, %v2451_v24, 0.0 }
0x145a   :  { %v2460_v23 = vsel %vm73_vm0, %v2452_v22, 0.0 }
0x145b   :  { %2461 = vadd.xlane.f32.xlu0 %v2460_v23 }
0x145f   :  { %2458 = vadd.xlane.f32.xlu0 %v2457_v25 }
0x14e8   :  { %v2462_v26 = vpop.xlane.xlu0 %2461 }
0x14e9   :  { %v2464_v27 = vmul.f32 0.03125, %v2462_v26 }
0x14eb   :  { %v2466_v52 = vsub.f32 %v2452_v22, %v2464_v27 }
0x14ec   :  { %v2459_v53 = vpop.xlane.xlu0 %2458 }
0x14ed   :  { %v2463_v29 = vmul.f32 0.03125, %v2459_v53  ;;  %v2468_v31 = vmul.f32 %v2466_v52, %v2466_v52 }
0x14ef   :  { %v2465_v32 = vsub.f32 %v2451_v24, %v2463_v29  ;;  %v2472_v33 = vsel %vm73_vm0, %v2468_v31, 0.0 }
0x14f0   :  { %2473 = vadd.xlane.f32.xlu0 %v2472_v33 }
0x14f1   :  { %v2467_v34 = vmul.f32 %v2465_v32, %v2465_v32 }
0x14f3   :  { %v2469_v35 = vsel %vm73_vm0, %v2467_v34, 0.0 }
0x14f4   :  { %2470 = vadd.xlane.f32.xlu1 %v2469_v35 }
0x157d   :  { %v2474_v40 = vpop.xlane.xlu0 %2473 }
0x157e   :  { %v2476_v41 = vmul.f32 0.03125, %v2474_v40 }
0x1580   :  { %v2478_v42 = vadd.f32 1e-12, %v2476_v41 }
0x1581   :  { %v2471_v48 = vpop.xlane.xlu1 %2470 }
0x1582   :  { %3197 = vrsqrt.f32 %v2478_v42  ;;  %v2475_v43 = vmul.f32 0.03125, %v2471_v48 }
0x1584   :  { %v2477_v44 = vadd.f32 1e-12, %v2475_v43 }
0x1586   :  { %3199 = vrsqrt.f32 %v2477_v44 }
0x158c   :  { %v3198_v46 = vpop.eup %3197 }
0x158d   :  { %v2482_v50 = vmul.f32 %v3198_v46, %v2466_v52 }
0x158f   :  { %v2490_v55 = vmul.f32 %v2777_v51, %v2482_v50 }
0x1590   :  { %v3200_v47 = vpop.eup %3199 }
0x1591   :  { %v2498_v56 = vadd.f32 %v2778_v54, %v2490_v55  ;;  %v2481_v49 = vmul.f32 %v3200_v47, %v2465_v32 }
0x1593   :  { %v2489_v57 = vmul.f32 %v2777_v51, %v2481_v49  ;;  %v2500_v58 = vrot.slane %v2498_v56, 7 }
0x1595   :  { %v2497_v59 = vadd.f32 %v2778_v54, %v2489_v57 }
0x1597   :  { %v2503_v60 = vsel %vm2502_vm6, %v2497_v59, %v2500_v58 }
0x1598   :  { %v2509_v61 = vpack.c.bf16 %v2503_v60, %v2503_v60 }
0x159a   :  { %3046 = vmatmul.mubr.msk.bf16.vlgmr.msra.gmra.mrb[52].mxu0 %vm73_vm0, %v2509_v61 }
0x159b   :  { %3053 = vmatprep.mubr.msk.bf16.mxu0 %vm3229_vm1, %v3228_v45  ;;  %3050 = vmatpush3.bf16.msra.mxu0 %v3107_v62 }
0x159c   :  { %3051 = vmatprep.subr.bf16.mxu0 %v3228_v45  ;;  %v2783_v45 = vld [vmem:[%s3867_s19] ss:$0 sm:$0xff] }
0x159f   :  { %3052 = vmatpush3.bf16.msra.mxu0 %v3108_v63 }
0x166d   :  { %v2565_v1 = vpop.f32.mrb[52].mxu0 }
0x166e   :  { %v2566_v2 = vadd.f32 %v2779_v0, %v2565_v1  ;;  %v3047_v3 = vpop.f32.mrb[53].mxu0 }
0x166f   :  { %v2568_v4 = vpop.f32.mrb[54].mxu0 }
0x1670   :  { %3201 = vtanh.f32 %v2566_v2  ;;  %v3048_v5 = vpop.f32.mrb[55].mxu0 }
0x167a   :  { %v3202_v6 = vpop.eup %3201 }
0x167b   :  { %v2577_v7 = vpack.c.bf16 %v3202_v6, %v3202_v6 }
0x167d   :  { %3054 = vmatmul.mubr.msk.bf16.vlgmr.msra.gmra.mrb[56].mxu0 %vm73_vm0, %v2577_v7 }
0x1750   :  { %v2633_v8 = vpop.f32.mrb[56].mxu0 }
0x1751   :  { %v2634_v9 = vadd.f32 %v2783_v45, %v2633_v8  ;;  %v3055_v10 = vpop.f32.mrb[57].mxu0 }
0x1752   :  { %v2636_v11 = vpop.f32.mrb[58].mxu0 }
0x1753   :  { %2639 = vst [vmem:[#allocation2] sm:$0x3] %v2634_v9  ;;  %v3056_v12 = vpop.f32.mrb[59].mxu0 }
0x1754   :  { %3214 = shalt.err (!%p3211_p4)
}
0x1755   :  { %s3215_s19 = scalar_lea.hbm %s3868_s20, 32 }
0x1756   :  { %p3216_p5 = scmp.ne.s32.totalorder %s3868_s20, %s3215_s19  ;;  %p3219_p6 = scmp.lt.u32.totalorder %s3215_s19, %s3868_s20 }
0x1758   :  { %p3221_p7 = pnand %p3219_p6, %p3216_p5 }
0x175a   :  { %3224 = shalt.err (!%p3221_p7)
}
0x175b   :  { %2649 = dma.vmem_to_hbm [thread:$0]  %s2647_s22, 32, %s3868_s20, [#allocation3]  }
0x175c   :  { %3225 = dma.done.wait [#allocation3], 32  }
0x175d   :  { %3226 = vsyncadd [#allocation3], 4294967264 }
0x175e   :  { %2653 = vsyncpa [#allocation3], 1 }

</bundles_post_ra>
